<compile_context>
chip_gen: v6e
topology: v6e:2x2x1
jax: 0.10.0
libtpu: 0.0.40
codegen_flags: <defaults>
</compile_context>

<pallas_src>
import jax
import jax.numpy as jnp
from jax.experimental import pallas as pl
from jax.experimental.pallas import tpu as pltpu

BN_EPS = 1e-5


def _choose_pack(B, W, Cout):
    """Pack P images along lanes until the narrowest layer reaches 128 lanes."""
    P = 1
    while P < B and B % (2 * P) == 0 and P * W * Cout < 128:
        P *= 2
    return P


def _banded_conv_weight(w_oihw, W, P, dtype=jnp.bfloat16):
    """(Co,Ci,3,3) conv weight -> fused banded matmul weight (3*P*W*Ci, P*W*Co).

    band[ky*P*W*Ci + p*W*Ci + xi*Ci + ci, q*W*Co + xo*Co + co] =
        w[co, ci, ky, xi-xo+1] when p==q and |xi-xo| <= 1, else 0.
    Encodes the kx taps, the horizontal zero padding and the block-diagonal
    image packing, so one lane-dense matmul per layer does the whole conv row.
    """
    Co, Ci, KH, KW = w_oihw.shape
    wt = jnp.transpose(w_oihw, (2, 3, 1, 0))                       # (ky, kx, Ci, Co)
    pos = jnp.arange(W)
    kx = jnp.arange(KW)
    # mask[kx, x_in, x_out] = 1 iff x_in == x_out + kx - 1
    mask = (pos[None, :, None] == pos[None, None, :] + kx[:, None, None] - 1)
    mask = mask.astype(w_oihw.dtype)                               # (KW, W, W)
    band = jnp.einsum('kio,ykcd->yicod', mask, wt).reshape(KH, W * Ci, W * Co)
    eyeP = jnp.eye(P, dtype=w_oihw.dtype)                          # block-diag pack
    bandP = jnp.einsum('pq,kab->kpaqb', eyeP, band).reshape(KH, P * W * Ci, P * W * Co)
    # fuse the 3 kernel rows into one K axis: rows [ky=0; ky=1; ky=2]
    return bandP.reshape(KH * P * W * Ci, P * W * Co).astype(dtype)


def _make_kernel(H, out_chans):
    """Fused 3x(Conv3x3 + bias + ReLU + BatchNorm) kernel; out_chans per layer."""

    def kernel(x_ref, band1, bgb1, band2, bgb2, band3, bgb3, out_ref):
        M = x_ref.shape[0]                                  # (B // P) * H rows
        # Row masks (computed once, shared by all layers): y==0 / y==H-1 zero
        # the rolled-in rows at image borders AND batch seams.
        row = jax.lax.broadcasted_iota(jnp.int32, (M, 1), 0)
        yy = row % H
        not_top = (yy != 0).astype(jnp.float32)             # (M, 1)
        not_bot = (yy != (H - 1)).astype(jnp.float32)       # (M, 1)

        def layer(act, band_ref, bgb_ref, co):
            # act: (M, Li) f32, lanes = (img, x, c)
            Mi, Li = act.shape
            # Vertical taps via sublane rolls + border masks (no padded scratch,
            # no misaligned slice copies).
            up = pltpu.roll(act, 1, 0) * not_top            # input row y-1
            dn = pltpu.roll(act, Mi - 1, 0) * not_bot       # input row y+1
            # One fused MXU matmul (K = 3*Li), bf16 in / f32 accumulate.
            lhs = jnp.concatenate([up.astype(jnp.bfloat16),
                                   act.astype(jnp.bfloat16),
                                   dn.astype(jnp.bfloat16)], axis=1)   # (M, 3*Li)
            acc = jnp.dot(lhs, band_ref[...],
                          preferred_element_type=jnp.float32)          # (M, Lo)
            acc = jnp.maximum(acc + bgb_ref[0:1, :], 0.0)              # bias + ReLU

            # BatchNorm2d: training-mode batch stats over (N,H,W), biased var,
            # exact f32.  Lane->channel all-reduce via a roll tree (stride=co)
            # which also re-broadcasts channel stats to every lane; no MXU use.
            Lo = acc.shape[1]
            colsum = jnp.sum(acc, axis=0, keepdims=True)               # (1, Lo)
            colsq = jnp.sum(acc * acc, axis=0, keepdims=True)          # (1, Lo)
            s = co
            while s < Lo:                                              # static unroll
                colsum = colsum + pltpu.roll(colsum, s, 1)
                colsq = colsq + pltpu.roll(colsq, s, 1)
                s *= 2
            inv_n = 1.0 / float(Mi * (Lo // co))                       # 1/(N*H*W)
            mean = colsum * inv_n
            var = jnp.maximum(colsq * inv_n - mean * mean, 0.0)        # clamp >= 0
            scale = bgb_ref[1:2, :] * jax.lax.rsqrt(var + BN_EPS)      # gamma lanes
            shift = bgb_ref[2:3, :] - mean * scale                     # beta lanes
            return acc * scale + shift                                 # (M, Lo) f32

        y1 = layer(x_ref[...], band1, bgb1, out_chans[0])
        y2 = layer(y1, band2, bgb2, out_chans[1])
        y3 = layer(y2, band3, bgb3, out_chans[2])
        out_ref[...] = y3.astype(out_ref.dtype)

    return kernel


def conv_mpn_forward(x_nchw, params):
    """Forward pass of ConvMpnModel. Input/output are NCHW (PyTorch layout)."""
    B, Cin, H, W = x_nchw.shape
    Cout = params[-1][0].shape[0]

    P = _choose_pack(B, W, Cout)
    M = (B // P) * H
    # The lane->channel roll-tree needs a power-of-two group count per channel.
    # TODO(synk): add a selector-matmul fallback when P*W is not a power of two.
    assert (P * W) & (P * W - 1) == 0, "P*W must be a power of two"

    # Layout plumbing (wrapper-side): NCHW -> rows=(b//P, y), lanes=(b%P, x, c).
    x2d = (jnp.transpose(x_nchw, (0, 2, 3, 1))
           .reshape(B // P, P, H, W, Cin)
           .transpose(0, 2, 1, 3, 4)
           .reshape(M, P * W * Cin))

    args = []
    out_chans = []
    flops = 0
    trans = 0
    for (w, b, g, be) in params:
        co = w.shape[0]
        out_chans.append(co)
        band = _banded_conv_weight(w, W, P)                # (3*P*W*ci, P*W*co) bf16
        bgb = jnp.stack([jnp.tile(b, P * W),               # bias  (lane-tiled)
                         jnp.tile(g, P * W),               # gamma (lane-tiled)
                         jnp.tile(be, P * W)]              # beta  (lane-tiled)
                        ).astype(jnp.float32)              # (3, P*W*co)
        args += [band, bgb]
        flops += 2 * M * band.shape[0] * band.shape[1]
        trans += band.shape[1]

    bytes_accessed = int(x2d.size * x2d.dtype.itemsize
                         + sum(a.size * a.dtype.itemsize for a in args)
                         + M * P * W * Cout * 4)

    # TODO(synk): for large B/H/W add a batch-parallel grid axis (to use the
    # second v7x TensorCore) with a cross-core / two-pass BatchNorm reduction,
    # and re-derive the VMEM budget for v7x (64 MiB physical, 32 MiB scoped
    # default).  At these shapes everything (<1 MiB) fits in VMEM and a single
    # gridless call minimizes launch/DMA overhead.
    out2d = pl.pallas_call(
        _make_kernel(H, out_chans),
        out_shape=jax.ShapeDtypeStruct((M, P * W * Cout), jnp.float32),
        in_specs=[pl.BlockSpec(memory_space=pltpu.MemorySpace.VMEM)] * (1 + len(args)),
        out_specs=pl.BlockSpec(memory_space=pltpu.MemorySpace.VMEM),
        cost_estimate=pl.CostEstimate(flops=int(flops), transcendentals=int(trans),
                                      bytes_accessed=bytes_accessed),
    )(x2d, *args)

    # lanes=(img, x, c) -> NCHW.  (If this module is called repeatedly, keep the
    # lane-dense layout across calls instead of round-tripping through NCHW.)
    return (out2d.reshape(B // P, H, P, W, Cout)
            .transpose(0, 2, 1, 3, 4)
            .reshape(B, H, W, Cout)
            .transpose(0, 3, 1, 2))


def init_params(key, inchannels, out_channels):
    """Deterministic parameter init matching the PyTorch __init__."""
    assert inchannels >= out_channels
    layer_chans = [(inchannels, inchannels),
                   (inchannels, out_channels),
                   (out_channels, out_channels)]
    params = []
    for ci, co in layer_chans:
        key, sub = jax.random.split(key)
        fan_in = ci * 3 * 3
        # kaiming_uniform_ with a=1: gain = sqrt(2/(1+1)) = 1, bound = sqrt(3/fan_in)
        bound = (3.0 / fan_in) ** 0.5
        w = jax.random.uniform(sub, (co, ci, 3, 3), jnp.float32, -bound, bound)
        b = jnp.zeros((co,), jnp.float32)          # nn.init.constant_(bias, 0)
        gamma = jnp.ones((co,), jnp.float32)       # BatchNorm2d default weight
        beta = jnp.zeros((co,), jnp.float32)       # BatchNorm2d default bias
        params.append((w, b, gamma, beta))
    return params


def reference_forward(x, params):
    """Pure-JAX (XLA) f32 reference of the PyTorch forward."""
    out = x
    for (w, b, g, be) in params:
        out = jax.lax.conv_general_dilated(
            out, w, window_strides=(1, 1), padding=((1, 1), (1, 1)),
            dimension_numbers=('NCHW', 'OIHW', 'NCHW'),
            precision=jax.lax.Precision.HIGHEST)
        out = jnp.maximum(out + b[None, :, None, None], 0.0)
        mean = jnp.mean(out, axis=(0, 2, 3), keepdims=True)
        var = jnp.mean((out - mean) ** 2, axis=(0, 2, 3), keepdims=True)
        out = ((out - mean) * jax.lax.rsqrt(var + BN_EPS)
               * g[None, :, None, None] + be[None, :, None, None])
    return out


if __name__ == "__main__":
    key = jax.random.PRNGKey(0)
    inchannels, out_channels = 8, 4
    B, H, W = 2, 16, 16

    key, xk = jax.random.split(key)
    x = jax.random.normal(xk, (B, inchannels, H, W), jnp.float32)
    params = init_params(key, inchannels, out_channels)

    fwd = jax.jit(conv_mpn_forward)
    out = jax.block_until_ready(fwd(x, params))

    assert out.shape == (B, out_channels, H, W), out.shape
    assert bool(jnp.all(jnp.isfinite(out)))

    # Sanity check vs the f32 reference (conv uses bf16 MXU inputs with f32
    # accumulation -> loose tolerance; BN statistics are exact f32).
    ref = reference_forward(x, params)
    max_err = float(jnp.max(jnp.abs(out - ref)))
    assert max_err < 0.2, f"max abs err {max_err}"

    print("KERNEL_OK")
</pallas_src>

<mosaic_0001>
module attributes {stable_mosaic.version = 11 : i64} {
  func.func @kernel(%arg0: memref<16x256xf32, #tpu.memory_space<vmem>>, %arg1: memref<768x256xbf16, #tpu.memory_space<vmem>>, %arg2: memref<3x256xf32, #tpu.memory_space<vmem>>, %arg3: memref<768x128xbf16, #tpu.memory_space<vmem>>, %arg4: memref<3x128xf32, #tpu.memory_space<vmem>>, %arg5: memref<384x128xbf16, #tpu.memory_space<vmem>>, %arg6: memref<3x128xf32, #tpu.memory_space<vmem>>, %arg7: memref<16x128xf32, #tpu.memory_space<vmem>>) attributes {dimension_semantics = [], scalar_prefetch = 0 : i64, scratch_operands = 0 : i64, tpu.core_type = #tpu.core_type<tc>} {
    %0 = tpu.iota {dimensions = array<i32: 0>} : vector<16x1xi32>
    %c16_i32 = arith.constant 16 : i32
    %c0_i32 = arith.constant 0 : i32
    %1 = arith.cmpi eq, %c16_i32, %c0_i32 : i32
    %c1_i32 = arith.constant 1 : i32
    %2 = arith.select %1, %c1_i32, %c16_i32 : i32
    %3 = vector.broadcast %2 : i32 to vector<16x1xi32>
    %4 = arith.remsi %0, %3 : vector<16x1xi32>
    %c0_i32_0 = arith.constant 0 : i32
    %5 = vector.broadcast %c0_i32_0 : i32 to vector<16x1xi32>
    %6 = arith.cmpi ne, %4, %5 : vector<16x1xi32>
    %c0_i32_1 = arith.constant 0 : i32
    %7 = vector.broadcast %c0_i32_1 : i32 to vector<16x1xi32>
    %8 = arith.cmpi slt, %4, %7 : vector<16x1xi32>
    %c0_i32_2 = arith.constant 0 : i32
    %9 = arith.cmpi slt, %2, %c0_i32_2 : i32
    %10 = vector.broadcast %9 : i1 to vector<16x1xi1>
    %11 = vector.broadcast %10 : vector<16x1xi1> to vector<16x1xi1>
    %12 = arith.xori %8, %11 : vector<16x1xi1>
    %13 = arith.andi %12, %6 : vector<16x1xi1>
    %14 = vector.broadcast %2 : i32 to vector<16x1xi32>
    %15 = arith.addi %4, %14 : vector<16x1xi32>
    %16 = arith.select %13, %15, %4 : vector<16x1xi1>, vector<16x1xi32>
    %c0_i32_3 = arith.constant 0 : i32
    %17 = vector.broadcast %c0_i32_3 : i32 to vector<16x1xi32>
    %18 = arith.cmpi ne, %16, %17 : vector<16x1xi32>
    %19 = arith.extui %18 : vector<16x1xi1> to vector<16x1xi32>
    %20 = arith.sitofp %19 : vector<16x1xi32> to vector<16x1xf32>
    %c15_i32 = arith.constant 15 : i32
    %21 = vector.broadcast %c15_i32 : i32 to vector<16x1xi32>
    %22 = arith.cmpi ne, %16, %21 : vector<16x1xi32>
    %23 = arith.extui %22 : vector<16x1xi1> to vector<16x1xi32>
    %24 = arith.sitofp %23 : vector<16x1xi32> to vector<16x1xf32>
    %c0 = arith.constant 0 : index
    %c0_4 = arith.constant 0 : index
    %25 = vector.load %arg0[%c0, %c0_4] : memref<16x256xf32, #tpu.memory_space<vmem>>, vector<16x256xf32>
    %c1_i32_5 = arith.constant 1 : i32
    %26 = tpu.dynamic_rotate %25 by %c1_i32_5 dim 0 : vector<16x256xf32>, i32 -> vector<16x256xf32>
    %27 = vector.broadcast %20 : vector<16x1xf32> to vector<16x256xf32>
    %28 = arith.mulf %26, %27 : vector<16x256xf32>
    %c15_i32_6 = arith.constant 15 : i32
    %29 = tpu.dynamic_rotate %25 by %c15_i32_6 dim 0 : vector<16x256xf32>, i32 -> vector<16x256xf32>
    %30 = vector.broadcast %24 : vector<16x1xf32> to vector<16x256xf32>
    %31 = arith.mulf %29, %30 : vector<16x256xf32>
    %32 = arith.truncf %28 : vector<16x256xf32> to vector<16x256xbf16>
    %33 = arith.truncf %25 : vector<16x256xf32> to vector<16x256xbf16>
    %34 = arith.truncf %31 : vector<16x256xf32> to vector<16x256xbf16>
    %35 = tpu.concatenate %32, %33, %34 in 1 : vector<16x256xbf16>, vector<16x256xbf16>, vector<16x256xbf16> -> vector<16x768xbf16>
    %c0_7 = arith.constant 0 : index
    %c0_8 = arith.constant 0 : index
    %36 = vector.load %arg1[%c0_7, %c0_8] : memref<768x256xbf16, #tpu.memory_space<vmem>>, vector<768x256xbf16>
    %cst = arith.constant dense<0.000000e+00> : vector<16x256xf32>
    %37 = tpu.matmul %35, %36, %cst {dimension_numbers = #tpu.dot_dimension_numbers<[1], [0], [0], [1], [0, 0, 1, 1], [], []>} : vector<16x768xbf16>, vector<768x256xbf16>, vector<16x256xf32> -> vector<16x256xf32>
    %c0_9 = arith.constant 0 : index
    %c0_10 = arith.constant 0 : index
    %38 = vector.load %arg2[%c0_9, %c0_10] : memref<3x256xf32, #tpu.memory_space<vmem>>, vector<1x256xf32>
    %39 = vector.broadcast %38 : vector<1x256xf32> to vector<16x256xf32>
    %40 = arith.addf %37, %39 : vector<16x256xf32>
    %cst_11 = arith.constant 0.000000e+00 : f32
    %41 = vector.broadcast %cst_11 : f32 to vector<16x256xf32>
    %42 = arith.maximumf %40, %41 : vector<16x256xf32>
    %cst_12 = arith.constant dense<0.000000e+00> : vector<256xf32>
    %43 = vector.multi_reduction <add>, %42, %cst_12 [0] : vector<16x256xf32> to vector<256xf32>
    %44 = vector.shape_cast %43 : vector<256xf32> to vector<1x256xf32>
    %45 = arith.mulf %42, %42 : vector<16x256xf32>
    %cst_13 = arith.constant dense<0.000000e+00> : vector<256xf32>
    %46 = vector.multi_reduction <add>, %45, %cst_13 [0] : vector<16x256xf32> to vector<256xf32>
    %47 = vector.shape_cast %46 : vector<256xf32> to vector<1x256xf32>
    %c8_i32 = arith.constant 8 : i32
    %48 = tpu.dynamic_rotate %44 by %c8_i32 dim 1 : vector<1x256xf32>, i32 -> vector<1x256xf32>
    %49 = arith.addf %44, %48 : vector<1x256xf32>
    %c8_i32_14 = arith.constant 8 : i32
    %50 = tpu.dynamic_rotate %47 by %c8_i32_14 dim 1 : vector<1x256xf32>, i32 -> vector<1x256xf32>
    %51 = arith.addf %47, %50 : vector<1x256xf32>
    %c16_i32_15 = arith.constant 16 : i32
    %52 = tpu.dynamic_rotate %49 by %c16_i32_15 dim 1 : vector<1x256xf32>, i32 -> vector<1x256xf32>
    %53 = arith.addf %49, %52 : vector<1x256xf32>
    %c16_i32_16 = arith.constant 16 : i32
    %54 = tpu.dynamic_rotate %51 by %c16_i32_16 dim 1 : vector<1x256xf32>, i32 -> vector<1x256xf32>
    %55 = arith.addf %51, %54 : vector<1x256xf32>
    %c32_i32 = arith.constant 32 : i32
    %56 = tpu.dynamic_rotate %53 by %c32_i32 dim 1 : vector<1x256xf32>, i32 -> vector<1x256xf32>
    %57 = arith.addf %53, %56 : vector<1x256xf32>
    %c32_i32_17 = arith.constant 32 : i32
    %58 = tpu.dynamic_rotate %55 by %c32_i32_17 dim 1 : vector<1x256xf32>, i32 -> vector<1x256xf32>
    %59 = arith.addf %55, %58 : vector<1x256xf32>
    %c64_i32 = arith.constant 64 : i32
    %60 = tpu.dynamic_rotate %57 by %c64_i32 dim 1 : vector<1x256xf32>, i32 -> vector<1x256xf32>
    %61 = arith.addf %57, %60 : vector<1x256xf32>
    %c64_i32_18 = arith.constant 64 : i32
    %62 = tpu.dynamic_rotate %59 by %c64_i32_18 dim 1 : vector<1x256xf32>, i32 -> vector<1x256xf32>
    %63 = arith.addf %59, %62 : vector<1x256xf32>
    %c128_i32 = arith.constant 128 : i32
    %64 = tpu.dynamic_rotate %61 by %c128_i32 dim 1 : vector<1x256xf32>, i32 -> vector<1x256xf32>
    %65 = arith.addf %61, %64 : vector<1x256xf32>
    %c128_i32_19 = arith.constant 128 : i32
    %66 = tpu.dynamic_rotate %63 by %c128_i32_19 dim 1 : vector<1x256xf32>, i32 -> vector<1x256xf32>
    %67 = arith.addf %63, %66 : vector<1x256xf32>
    %cst_20 = arith.constant 0.001953125 : f32
    %68 = vector.broadcast %cst_20 : f32 to vector<1x256xf32>
    %69 = arith.mulf %65, %68 : vector<1x256xf32>
    %cst_21 = arith.constant 0.001953125 : f32
    %70 = vector.broadcast %cst_21 : f32 to vector<1x256xf32>
    %71 = arith.mulf %67, %70 : vector<1x256xf32>
    %72 = arith.mulf %69, %69 : vector<1x256xf32>
    %73 = arith.subf %71, %72 : vector<1x256xf32>
    %cst_22 = arith.constant 0.000000e+00 : f32
    %74 = vector.broadcast %cst_22 : f32 to vector<1x256xf32>
    %75 = arith.maximumf %73, %74 : vector<1x256xf32>
    %c1 = arith.constant 1 : index
    %c0_23 = arith.constant 0 : index
    %76 = vector.load %arg2[%c1, %c0_23] : memref<3x256xf32, #tpu.memory_space<vmem>>, vector<1x256xf32>
    %cst_24 = arith.constant 9.99999974E-6 : f32
    %77 = vector.broadcast %cst_24 : f32 to vector<1x256xf32>
    %78 = arith.addf %75, %77 : vector<1x256xf32>
    %79 = math.rsqrt %78 : vector<1x256xf32>
    %80 = arith.mulf %76, %79 : vector<1x256xf32>
    %c2 = arith.constant 2 : index
    %c0_25 = arith.constant 0 : index
    %81 = vector.load %arg2[%c2, %c0_25] : memref<3x256xf32, #tpu.memory_space<vmem>>, vector<1x256xf32>
    %82 = arith.mulf %69, %80 : vector<1x256xf32>
    %83 = arith.subf %81, %82 : vector<1x256xf32>
    %84 = vector.broadcast %80 : vector<1x256xf32> to vector<16x256xf32>
    %85 = arith.mulf %42, %84 : vector<16x256xf32>
    %86 = vector.broadcast %83 : vector<1x256xf32> to vector<16x256xf32>
    %87 = arith.addf %85, %86 : vector<16x256xf32>
    %c1_i32_26 = arith.constant 1 : i32
    %88 = tpu.dynamic_rotate %87 by %c1_i32_26 dim 0 : vector<16x256xf32>, i32 -> vector<16x256xf32>
    %89 = vector.broadcast %20 : vector<16x1xf32> to vector<16x256xf32>
    %90 = arith.mulf %88, %89 : vector<16x256xf32>
    %c15_i32_27 = arith.constant 15 : i32
    %91 = tpu.dynamic_rotate %87 by %c15_i32_27 dim 0 : vector<16x256xf32>, i32 -> vector<16x256xf32>
    %92 = vector.broadcast %24 : vector<16x1xf32> to vector<16x256xf32>
    %93 = arith.mulf %91, %92 : vector<16x256xf32>
    %94 = arith.truncf %90 : vector<16x256xf32> to vector<16x256xbf16>
    %95 = arith.truncf %87 : vector<16x256xf32> to vector<16x256xbf16>
    %96 = arith.truncf %93 : vector<16x256xf32> to vector<16x256xbf16>
    %97 = tpu.concatenate %94, %95, %96 in 1 : vector<16x256xbf16>, vector<16x256xbf16>, vector<16x256xbf16> -> vector<16x768xbf16>
    %c0_28 = arith.constant 0 : index
    %c0_29 = arith.constant 0 : index
    %98 = vector.load %arg3[%c0_28, %c0_29] : memref<768x128xbf16, #tpu.memory_space<vmem>>, vector<768x128xbf16>
    %cst_30 = arith.constant dense<0.000000e+00> : vector<16x128xf32>
    %99 = tpu.matmul %97, %98, %cst_30 {dimension_numbers = #tpu.dot_dimension_numbers<[1], [0], [0], [1], [0, 0, 1, 1], [], []>} : vector<16x768xbf16>, vector<768x128xbf16>, vector<16x128xf32> -> vector<16x128xf32>
    %c0_31 = arith.constant 0 : index
    %c0_32 = arith.constant 0 : index
    %100 = vector.load %arg4[%c0_31, %c0_32] : memref<3x128xf32, #tpu.memory_space<vmem>>, vector<1x128xf32>
    %101 = vector.broadcast %100 : vector<1x128xf32> to vector<16x128xf32>
    %102 = arith.addf %99, %101 : vector<16x128xf32>
    %cst_33 = arith.constant 0.000000e+00 : f32
    %103 = vector.broadcast %cst_33 : f32 to vector<16x128xf32>
    %104 = arith.maximumf %102, %103 : vector<16x128xf32>
    %cst_34 = arith.constant dense<0.000000e+00> : vector<128xf32>
    %105 = vector.multi_reduction <add>, %104, %cst_34 [0] : vector<16x128xf32> to vector<128xf32>
    %106 = vector.shape_cast %105 : vector<128xf32> to vector<1x128xf32>
    %107 = arith.mulf %104, %104 : vector<16x128xf32>
    %cst_35 = arith.constant dense<0.000000e+00> : vector<128xf32>
    %108 = vector.multi_reduction <add>, %107, %cst_35 [0] : vector<16x128xf32> to vector<128xf32>
    %109 = vector.shape_cast %108 : vector<128xf32> to vector<1x128xf32>
    %c4_i32 = arith.constant 4 : i32
    %110 = tpu.dynamic_rotate %106 by %c4_i32 dim 1 : vector<1x128xf32>, i32 -> vector<1x128xf32>
    %111 = arith.addf %106, %110 : vector<1x128xf32>
    %c4_i32_36 = arith.constant 4 : i32
    %112 = tpu.dynamic_rotate %109 by %c4_i32_36 dim 1 : vector<1x128xf32>, i32 -> vector<1x128xf32>
    %113 = arith.addf %109, %112 : vector<1x128xf32>
    %c8_i32_37 = arith.constant 8 : i32
    %114 = tpu.dynamic_rotate %111 by %c8_i32_37 dim 1 : vector<1x128xf32>, i32 -> vector<1x128xf32>
    %115 = arith.addf %111, %114 : vector<1x128xf32>
    %c8_i32_38 = arith.constant 8 : i32
    %116 = tpu.dynamic_rotate %113 by %c8_i32_38 dim 1 : vector<1x128xf32>, i32 -> vector<1x128xf32>
    %117 = arith.addf %113, %116 : vector<1x128xf32>
    %c16_i32_39 = arith.constant 16 : i32
    %118 = tpu.dynamic_rotate %115 by %c16_i32_39 dim 1 : vector<1x128xf32>, i32 -> vector<1x128xf32>
    %119 = arith.addf %115, %118 : vector<1x128xf32>
    %c16_i32_40 = arith.constant 16 : i32
    %120 = tpu.dynamic_rotate %117 by %c16_i32_40 dim 1 : vector<1x128xf32>, i32 -> vector<1x128xf32>
    %121 = arith.addf %117, %120 : vector<1x128xf32>
    %c32_i32_41 = arith.constant 32 : i32
    %122 = tpu.dynamic_rotate %119 by %c32_i32_41 dim 1 : vector<1x128xf32>, i32 -> vector<1x128xf32>
    %123 = arith.addf %119, %122 : vector<1x128xf32>
    %c32_i32_42 = arith.constant 32 : i32
    %124 = tpu.dynamic_rotate %121 by %c32_i32_42 dim 1 : vector<1x128xf32>, i32 -> vector<1x128xf32>
    %125 = arith.addf %121, %124 : vector<1x128xf32>
    %c64_i32_43 = arith.constant 64 : i32
    %126 = tpu.dynamic_rotate %123 by %c64_i32_43 dim 1 : vector<1x128xf32>, i32 -> vector<1x128xf32>
    %127 = arith.addf %123, %126 : vector<1x128xf32>
    %c64_i32_44 = arith.constant 64 : i32
    %128 = tpu.dynamic_rotate %125 by %c64_i32_44 dim 1 : vector<1x128xf32>, i32 -> vector<1x128xf32>
    %129 = arith.addf %125, %128 : vector<1x128xf32>
    %cst_45 = arith.constant 0.001953125 : f32
    %130 = vector.broadcast %cst_45 : f32 to vector<1x128xf32>
    %131 = arith.mulf %127, %130 : vector<1x128xf32>
    %cst_46 = arith.constant 0.001953125 : f32
    %132 = vector.broadcast %cst_46 : f32 to vector<1x128xf32>
    %133 = arith.mulf %129, %132 : vector<1x128xf32>
    %134 = arith.mulf %131, %131 : vector<1x128xf32>
    %135 = arith.subf %133, %134 : vector<1x128xf32>
    %cst_47 = arith.constant 0.000000e+00 : f32
    %136 = vector.broadcast %cst_47 : f32 to vector<1x128xf32>
    %137 = arith.maximumf %135, %136 : vector<1x128xf32>
    %c1_48 = arith.constant 1 : index
    %c0_49 = arith.constant 0 : index
    %138 = vector.load %arg4[%c1_48, %c0_49] : memref<3x128xf32, #tpu.memory_space<vmem>>, vector<1x128xf32>
    %cst_50 = arith.constant 9.99999974E-6 : f32
    %139 = vector.broadcast %cst_50 : f32 to vector<1x128xf32>
    %140 = arith.addf %137, %139 : vector<1x128xf32>
    %141 = math.rsqrt %140 : vector<1x128xf32>
    %142 = arith.mulf %138, %141 : vector<1x128xf32>
    %c2_51 = arith.constant 2 : index
    %c0_52 = arith.constant 0 : index
    %143 = vector.load %arg4[%c2_51, %c0_52] : memref<3x128xf32, #tpu.memory_space<vmem>>, vector<1x128xf32>
    %144 = arith.mulf %131, %142 : vector<1x128xf32>
    %145 = arith.subf %143, %144 : vector<1x128xf32>
    %146 = vector.broadcast %142 : vector<1x128xf32> to vector<16x128xf32>
    %147 = arith.mulf %104, %146 : vector<16x128xf32>
    %148 = vector.broadcast %145 : vector<1x128xf32> to vector<16x128xf32>
    %149 = arith.addf %147, %148 : vector<16x128xf32>
    %c1_i32_53 = arith.constant 1 : i32
    %150 = tpu.dynamic_rotate %149 by %c1_i32_53 dim 0 : vector<16x128xf32>, i32 -> vector<16x128xf32>
    %151 = vector.broadcast %20 : vector<16x1xf32> to vector<16x128xf32>
    %152 = arith.mulf %150, %151 : vector<16x128xf32>
    %c15_i32_54 = arith.constant 15 : i32
    %153 = tpu.dynamic_rotate %149 by %c15_i32_54 dim 0 : vector<16x128xf32>, i32 -> vector<16x128xf32>
    %154 = vector.broadcast %24 : vector<16x1xf32> to vector<16x128xf32>
    %155 = arith.mulf %153, %154 : vector<16x128xf32>
    %156 = arith.truncf %152 : vector<16x128xf32> to vector<16x128xbf16>
    %157 = arith.truncf %149 : vector<16x128xf32> to vector<16x128xbf16>
    %158 = arith.truncf %155 : vector<16x128xf32> to vector<16x128xbf16>
    %159 = tpu.concatenate %156, %157, %158 in 1 : vector<16x128xbf16>, vector<16x128xbf16>, vector<16x128xbf16> -> vector<16x384xbf16>
    %c0_55 = arith.constant 0 : index
    %c0_56 = arith.constant 0 : index
    %160 = vector.load %arg5[%c0_55, %c0_56] : memref<384x128xbf16, #tpu.memory_space<vmem>>, vector<384x128xbf16>
    %cst_57 = arith.constant dense<0.000000e+00> : vector<16x128xf32>
    %161 = tpu.matmul %159, %160, %cst_57 {dimension_numbers = #tpu.dot_dimension_numbers<[1], [0], [0], [1], [0, 0, 1, 1], [], []>} : vector<16x384xbf16>, vector<384x128xbf16>, vector<16x128xf32> -> vector<16x128xf32>
    %c0_58 = arith.constant 0 : index
    %c0_59 = arith.constant 0 : index
    %162 = vector.load %arg6[%c0_58, %c0_59] : memref<3x128xf32, #tpu.memory_space<vmem>>, vector<1x128xf32>
    %163 = vector.broadcast %162 : vector<1x128xf32> to vector<16x128xf32>
    %164 = arith.addf %161, %163 : vector<16x128xf32>
    %cst_60 = arith.constant 0.000000e+00 : f32
    %165 = vector.broadcast %cst_60 : f32 to vector<16x128xf32>
    %166 = arith.maximumf %164, %165 : vector<16x128xf32>
    %cst_61 = arith.constant dense<0.000000e+00> : vector<128xf32>
    %167 = vector.multi_reduction <add>, %166, %cst_61 [0] : vector<16x128xf32> to vector<128xf32>
    %168 = vector.shape_cast %167 : vector<128xf32> to vector<1x128xf32>
    %169 = arith.mulf %166, %166 : vector<16x128xf32>
    %cst_62 = arith.constant dense<0.000000e+00> : vector<128xf32>
    %170 = vector.multi_reduction <add>, %169, %cst_62 [0] : vector<16x128xf32> to vector<128xf32>
    %171 = vector.shape_cast %170 : vector<128xf32> to vector<1x128xf32>
    %c4_i32_63 = arith.constant 4 : i32
    %172 = tpu.dynamic_rotate %168 by %c4_i32_63 dim 1 : vector<1x128xf32>, i32 -> vector<1x128xf32>
    %173 = arith.addf %168, %172 : vector<1x128xf32>
    %c4_i32_64 = arith.constant 4 : i32
    %174 = tpu.dynamic_rotate %171 by %c4_i32_64 dim 1 : vector<1x128xf32>, i32 -> vector<1x128xf32>
    %175 = arith.addf %171, %174 : vector<1x128xf32>
    %c8_i32_65 = arith.constant 8 : i32
    %176 = tpu.dynamic_rotate %173 by %c8_i32_65 dim 1 : vector<1x128xf32>, i32 -> vector<1x128xf32>
    %177 = arith.addf %173, %176 : vector<1x128xf32>
    %c8_i32_66 = arith.constant 8 : i32
    %178 = tpu.dynamic_rotate %175 by %c8_i32_66 dim 1 : vector<1x128xf32>, i32 -> vector<1x128xf32>
    %179 = arith.addf %175, %178 : vector<1x128xf32>
    %c16_i32_67 = arith.constant 16 : i32
    %180 = tpu.dynamic_rotate %177 by %c16_i32_67 dim 1 : vector<1x128xf32>, i32 -> vector<1x128xf32>
    %181 = arith.addf %177, %180 : vector<1x128xf32>
    %c16_i32_68 = arith.constant 16 : i32
    %182 = tpu.dynamic_rotate %179 by %c16_i32_68 dim 1 : vector<1x128xf32>, i32 -> vector<1x128xf32>
    %183 = arith.addf %179, %182 : vector<1x128xf32>
    %c32_i32_69 = arith.constant 32 : i32
    %184 = tpu.dynamic_rotate %181 by %c32_i32_69 dim 1 : vector<1x128xf32>, i32 -> vector<1x128xf32>
    %185 = arith.addf %181, %184 : vector<1x128xf32>
    %c32_i32_70 = arith.constant 32 : i32
    %186 = tpu.dynamic_rotate %183 by %c32_i32_70 dim 1 : vector<1x128xf32>, i32 -> vector<1x128xf32>
    %187 = arith.addf %183, %186 : vector<1x128xf32>
    %c64_i32_71 = arith.constant 64 : i32
    %188 = tpu.dynamic_rotate %185 by %c64_i32_71 dim 1 : vector<1x128xf32>, i32 -> vector<1x128xf32>
    %189 = arith.addf %185, %188 : vector<1x128xf32>
    %c64_i32_72 = arith.constant 64 : i32
    %190 = tpu.dynamic_rotate %187 by %c64_i32_72 dim 1 : vector<1x128xf32>, i32 -> vector<1x128xf32>
    %191 = arith.addf %187, %190 : vector<1x128xf32>
    %cst_73 = arith.constant 0.001953125 : f32
    %192 = vector.broadcast %cst_73 : f32 to vector<1x128xf32>
    %193 = arith.mulf %189, %192 : vector<1x128xf32>
    %cst_74 = arith.constant 0.001953125 : f32
    %194 = vector.broadcast %cst_74 : f32 to vector<1x128xf32>
    %195 = arith.mulf %191, %194 : vector<1x128xf32>
    %196 = arith.mulf %193, %193 : vector<1x128xf32>
    %197 = arith.subf %195, %196 : vector<1x128xf32>
    %cst_75 = arith.constant 0.000000e+00 : f32
    %198 = vector.broadcast %cst_75 : f32 to vector<1x128xf32>
    %199 = arith.maximumf %197, %198 : vector<1x128xf32>
    %c1_76 = arith.constant 1 : index
    %c0_77 = arith.constant 0 : index
    %200 = vector.load %arg6[%c1_76, %c0_77] : memref<3x128xf32, #tpu.memory_space<vmem>>, vector<1x128xf32>
    %cst_78 = arith.constant 9.99999974E-6 : f32
    %201 = vector.broadcast %cst_78 : f32 to vector<1x128xf32>
    %202 = arith.addf %199, %201 : vector<1x128xf32>
    %203 = math.rsqrt %202 : vector<1x128xf32>
    %204 = arith.mulf %200, %203 : vector<1x128xf32>
    %c2_79 = arith.constant 2 : index
    %c0_80 = arith.constant 0 : index
    %205 = vector.load %arg6[%c2_79, %c0_80] : memref<3x128xf32, #tpu.memory_space<vmem>>, vector<1x128xf32>
    %206 = arith.mulf %193, %204 : vector<1x128xf32>
    %207 = arith.subf %205, %206 : vector<1x128xf32>
    %208 = vector.broadcast %204 : vector<1x128xf32> to vector<16x128xf32>
    %209 = arith.mulf %166, %208 : vector<16x128xf32>
    %210 = vector.broadcast %207 : vector<1x128xf32> to vector<16x128xf32>
    %211 = arith.addf %209, %210 : vector<16x128xf32>
    %c0_81 = arith.constant 0 : index
    %c0_82 = arith.constant 0 : index
    %212 = vector.load %arg7[%c0_81, %c0_82] : memref<16x128xf32, #tpu.memory_space<vmem>>, vector<16x128xf32>
    tpu.vector_store %arg7[%c0_81, %c0_82], %211 {strides = array<i32>} : memref<16x128xf32, #tpu.memory_space<vmem>>, vector<16x128xf32>,
    return
  }
}

</mosaic_0001>

<bundles_post_ra>
// kernel: tile.63
= control target key start
LH: loop header
LB: loop body
LE: loop exit
PB: predicated region body
PF: predicated region fallthrough
CT: control target
= control target key end

     0   :  { %s40_s0 = inlined_call_operand.vmem [shape: f32[4], index: 0, kind: input, shape index: {}]   ;;  %s41_s1 = inlined_call_operand.vmem [shape: f32[32,4], index: 1, kind: output, shape index: {}]  }
   0x1   :  { %v4_v0 = vld [vmem:[%s40_s0] ss:$0 sm:$0xff] }
   0x2   :  { %5 = vst [vmem:[%s41_s1] sm:$0xff] %v4_v0  ;;  %12 = vst [vmem:[%s41_s1 + $0x8] sm:$0xff] %v4_v0 }
   0x3   :  { %13 = vst [vmem:[%s41_s1 + $0x10] sm:$0xff] %v4_v0  ;;  %14 = vst [vmem:[%s41_s1 + $0x18] sm:$0xff] %v4_v0 }

// kernel: tile.72
= control target key start
LH: loop header
LB: loop body
LE: loop exit
PB: predicated region body
PF: predicated region fallthrough
CT: control target
= control target key end

     0   :  { %s261_s10 = smov 124   ;;  %s262_s11 = smov 116   ;;  %vm3_vm0 = vcmask 31744   ;;  %vm9_vm1 = vcmask 1048544   ;;  %vm15_vm2 = vcmask 1015744   ;;  %vm21_vm3 = vcmask 982944   ;;  %s401_s0 = inlined_call_operand.vmem [shape: f32[32,4], index: 0, kind: input, shape index: {}]   ;;  %s402_s1 = inlined_call_operand.vmem [shape: f32[1,128], index: 1, kind: output, shape index: {}]  }
   0x1   :  { %v199_v0 = vld [vmem:[%s401_s0 + $0x1f] sm:$0x1]   ;;  %v201_v1 = vld [vmem:[%s401_s0 + $0x1d] sm:$0x1]   ;;  %v200_v2 = vld [vmem:[%s401_s0 + $0x1e] sm:$0x1]  }
   0x2   :  { %7 = vrot.lane.b32.xlu0 %v199_v0, %s261_s10  ;;  %19 = vrot.lane.b32.xlu1 %v201_v1, %s262_s11  ;;  %v202_v3 = vld [vmem:[%s401_s0 + $0x1c] sm:$0x1]   ;;  %s263_s16 = smov 120   ;;  %s264_s17 = smov 112   ;;  %v203_v4 = vld [vmem:[%s401_s0 + $0x1b] sm:$0x1]  }
   0x3   :  { %v204_v5 = vld [vmem:[%s401_s0 + $0x1a] sm:$0x1]   ;;  %s265_s22 = smov 108   ;;  %s266_s23 = smov 104   ;;  %v205_v6 = vld [vmem:[%s401_s0 + $0x19] sm:$0x1]  }
   0x4   :  { %v206_v7 = vld [vmem:[%s401_s0 + $0x18] sm:$0x1]   ;;  %s267_s28 = smov 100   ;;  %s268_s29 = smov 96   ;;  %v207_v8 = vld [vmem:[%s401_s0 + $0x17] sm:$0x1]  }
   0x5   :  { %v208_v9 = vld [vmem:[%s401_s0 + $0x16] sm:$0x1]   ;;  %v2_v10 = vld [vmem:[%s401_s0] sm:$0x1]   ;;  %s269_s7 = smov 92   ;;  %s270_s8 = smov 88  }
   0x6   :  { %13 = vrot.lane.b32.xlu0 %v200_v2, %s263_s16  ;;  %25 = vrot.lane.b32.xlu1 %v202_v3, %s264_s17  ;;  %4 = vst.msk [vmem:[#allocation0] sm:$0x1] %vm3_vm0, %v2_v10   ;;  %v209_v11 = vld [vmem:[%s401_s0 + $0x15] sm:$0x1]   ;;  %v210_v12 = vld [vmem:[%s401_s0 + $0x14] sm:$0x1]  }
   0x7   :  { %s271_s13 = smov 84   ;;  %s272_s14 = smov 80   ;;  %v211_v13 = vld [vmem:[%s401_s0 + $0x13] sm:$0x1]   ;;  %v212_v14 = vld [vmem:[%s401_s0 + $0x12] sm:$0x1]  }
   0x8   :  { %s273_s19 = smov 76   ;;  %s274_s20 = smov 72   ;;  %v213_v15 = vld [vmem:[%s401_s0 + $0x11] sm:$0x1]   ;;  %v214_v16 = vld [vmem:[%s401_s0 + $0x10] sm:$0x1]  }
   0x9   :  { %s275_s25 = smov 68   ;;  %s276_s26 = smov 64   ;;  %v215_v17 = vld [vmem:[%s401_s0 + $0xf] sm:$0x1]   ;;  %v216_v18 = vld [vmem:[%s401_s0 + $0xe] sm:$0x1]  }
   0xa   :  { %31 = vrot.lane.b32.xlu0 %v203_v4, %s265_s22  ;;  %37 = vrot.lane.b32.xlu1 %v204_v5, %s266_s23  ;;  %s277_s2 = smov 60   ;;  %s278_s3 = smov 56   ;;  %v217_v19 = vld [vmem:[%s401_s0 + $0xd] sm:$0x1]   ;;  %v218_v20 = vld [vmem:[%s401_s0 + $0xc] sm:$0x1]  }
   0xb   :  { %s280_s9 = smov 48   ;;  %v219_v21 = vld [vmem:[%s401_s0 + $0xb] sm:$0x1]   ;;  %v220_v22 = vld [vmem:[%s401_s0 + $0xa] sm:$0x1]   ;;  %s282_s15 = smov 40  }
   0xc   :  { %v221_v23 = vld [vmem:[%s401_s0 + $0x9] sm:$0x1]   ;;  %v222_v24 = vld [vmem:[%s401_s0 + $0x8] sm:$0x1]   ;;  %s284_s21 = smov 32   ;;  %s286_s27 = smov 24  }
   0xd   :  { %v223_v25 = vld [vmem:[%s401_s0 + $0x7] sm:$0x1]   ;;  %v224_v26 = vld [vmem:[%s401_s0 + $0x6] sm:$0x1]   ;;  %v225_v27 = vld [vmem:[%s401_s0 + $0x5] sm:$0x1]  }
   0xe   :  { %43 = vrot.lane.b32.xlu0 %v205_v6, %s267_s28  ;;  %49 = vrot.lane.b32.xlu1 %v206_v7, %s268_s29  ;;  %v226_v28 = vld [vmem:[%s401_s0 + $0x4] sm:$0x1]   ;;  %s288_s4 = smov 16   ;;  %v227_v29 = vld [vmem:[%s401_s0 + $0x3] sm:$0x1]   ;;  %s290_s10 = smov 8  }
   0xf   :  { %v228_v30 = vld [vmem:[%s401_s0 + $0x2] sm:$0x1]   ;;  %v229_v31 = vld [vmem:[%s401_s0 + $0x1] sm:$0x1]   ;;  %s291_s0 = smov 4   ;;  %vm27_vm4 = vcmask 950144  }
  0x10   :  { %vm33_vm5 = vcmask 917344   ;;  %vm39_vm6 = vcmask 884544   ;;  %vm45_vm7 = vcmask 851744   ;;  %vm51_vm8 = vcmask 818944  }
  0x11   :  { %vm57_vm9 = vcmask 786144   ;;  %vm63_vm10 = vcmask 753344   ;;  %vm69_vm11 = vcmask 720544   ;;  %vm75_vm12 = vcmask 687744  }
  0x12   :  { %55 = vrot.lane.b32.xlu0 %v207_v8, %s269_s7  ;;  %61 = vrot.lane.b32.xlu1 %v208_v9, %s270_s8  ;;  %s279_s8 = smov 52   ;;  %vm81_vm13 = vcmask 654944   ;;  %vm87_vm14 = vcmask 622144   ;;  %vm93_vm15 = vcmask 589344   ;;  %vm99_vm0 = vcmask 556544  }
  0x16   :  { %67 = vrot.lane.b32.xlu0 %v209_v11, %s271_s13  ;;  %73 = vrot.lane.b32.xlu1 %v210_v12, %s272_s14  ;;  %s281_s14 = smov 44  }
  0x1a   :  { %79 = vrot.lane.b32.xlu0 %v211_v13, %s273_s19  ;;  %85 = vrot.lane.b32.xlu1 %v212_v14, %s274_s20  ;;  %s283_s20 = smov 36  }
  0x1e   :  { %91 = vrot.lane.b32.xlu0 %v213_v15, %s275_s25  ;;  %97 = vrot.lane.b32.xlu1 %v214_v16, %s276_s26  ;;  %s285_s26 = smov 28  }
  0x22   :  { %103 = vrot.lane.b32.xlu0 %v215_v17, %s277_s2  ;;  %109 = vrot.lane.b32.xlu1 %v216_v18, %s278_s3  ;;  %s287_s3 = smov 20  }
  0x26   :  { %115 = vrot.lane.b32.xlu0 %v217_v19, %s279_s8  ;;  %121 = vrot.lane.b32.xlu1 %v218_v20, %s280_s9  ;;  %s289_s9 = smov 12  }
  0x2a   :  { %127 = vrot.lane.b32.xlu0 %v219_v21, %s281_s14  ;;  %133 = vrot.lane.b32.xlu1 %v220_v22, %s282_s15 }
  0x2e   :  { %139 = vrot.lane.b32.xlu0 %v221_v23, %s283_s20  ;;  %145 = vrot.lane.b32.xlu1 %v222_v24, %s284_s21 }
  0x32   :  { %151 = vrot.lane.b32.xlu0 %v223_v25, %s285_s26  ;;  %157 = vrot.lane.b32.xlu1 %v224_v26, %s286_s27 }
  0x36   :  { %163 = vrot.lane.b32.xlu0 %v225_v27, %s287_s3  ;;  %169 = vrot.lane.b32.xlu1 %v226_v28, %s288_s4 }
  0x3a   :  { %175 = vrot.lane.b32.xlu0 %v227_v29, %s289_s9  ;;  %181 = vrot.lane.b32.xlu1 %v228_v30, %s290_s10 }
  0x3e   :  { %187 = vrot.lane.b32.xlu0 %v229_v31, %s291_s0 }
  0x74   :  { %v8_v32 = vpop.permute.xlu0 %7   ;;  %v20_v33 = vpop.permute.xlu1 %19  }
  0x75   :  { %10 = vst.msk [vmem:[#allocation0] sm:$0x1] %vm9_vm1, %v8_v32   ;;  %vm105_vm1 = vcmask 523744  }
  0x78   :  { %v14_v34 = vpop.permute.xlu0 %13   ;;  %v26_v35 = vpop.permute.xlu1 %25  }
  0x79   :  { %16 = vst.msk [vmem:[#allocation0] sm:$0x1] %vm15_vm2, %v14_v34   ;;  %vm111_vm2 = vcmask 490944  }
  0x7a   :  { %22 = vst.msk [vmem:[#allocation0] sm:$0x1] %vm21_vm3, %v20_v33   ;;  %vm117_vm3 = vcmask 458144  }
  0x7b   :  { %28 = vst.msk [vmem:[#allocation0] sm:$0x1] %vm27_vm4, %v26_v35   ;;  %vm123_vm4 = vcmask 425344  }
  0x7c   :  { %v32_v36 = vpop.permute.xlu0 %31   ;;  %v38_v37 = vpop.permute.xlu1 %37  }
  0x7d   :  { %34 = vst.msk [vmem:[#allocation0] sm:$0x1] %vm33_vm5, %v32_v36   ;;  %vm129_vm5 = vcmask 392544  }
  0x7e   :  { %40 = vst.msk [vmem:[#allocation0] sm:$0x1] %vm39_vm6, %v38_v37   ;;  %vm135_vm6 = vcmask 359744  }
  0x80   :  { %v44_v38 = vpop.permute.xlu0 %43   ;;  %v50_v39 = vpop.permute.xlu1 %49  }
  0x81   :  { %46 = vst.msk [vmem:[#allocation0] sm:$0x1] %vm45_vm7, %v44_v38   ;;  %vm141_vm7 = vcmask 326944  }
  0x82   :  { %52 = vst.msk [vmem:[#allocation0] sm:$0x1] %vm51_vm8, %v50_v39   ;;  %vm147_vm8 = vcmask 294144  }
  0x84   :  { %v56_v40 = vpop.permute.xlu0 %55   ;;  %v62_v41 = vpop.permute.xlu1 %61  }
  0x85   :  { %58 = vst.msk [vmem:[#allocation0] sm:$0x1] %vm57_vm9, %v56_v40   ;;  %vm153_vm9 = vcmask 261344  }
  0x86   :  { %64 = vst.msk [vmem:[#allocation0] sm:$0x1] %vm63_vm10, %v62_v41   ;;  %vm159_vm10 = vcmask 228544  }
  0x88   :  { %v68_v42 = vpop.permute.xlu0 %67   ;;  %v74_v43 = vpop.permute.xlu1 %73  }
  0x89   :  { %70 = vst.msk [vmem:[#allocation0] sm:$0x1] %vm69_vm11, %v68_v42   ;;  %vm165_vm11 = vcmask 195744  }
  0x8a   :  { %76 = vst.msk [vmem:[#allocation0] sm:$0x1] %vm75_vm12, %v74_v43   ;;  %vm171_vm12 = vcmask 162944  }
  0x8c   :  { %v80_v44 = vpop.permute.xlu0 %79   ;;  %v86_v45 = vpop.permute.xlu1 %85  }
  0x8d   :  { %82 = vst.msk [vmem:[#allocation0] sm:$0x1] %vm81_vm13, %v80_v44   ;;  %vm177_vm13 = vcmask 130144  }
  0x8e   :  { %88 = vst.msk [vmem:[#allocation0] sm:$0x1] %vm87_vm14, %v86_v45   ;;  %vm183_vm14 = vcmask 97344  }
  0x90   :  { %v92_v46 = vpop.permute.xlu0 %91   ;;  %v98_v47 = vpop.permute.xlu1 %97  }
  0x91   :  { %94 = vst.msk [vmem:[#allocation0] sm:$0x1] %vm93_vm15, %v92_v46   ;;  %vm189_vm15 = vcmask 64544  }
  0x92   :  { %100 = vst.msk [vmem:[#allocation0] sm:$0x1] %vm99_vm0, %v98_v47  }
  0x94   :  { %v104_v48 = vpop.permute.xlu0 %103   ;;  %v110_v49 = vpop.permute.xlu1 %109  }
  0x95   :  { %106 = vst.msk [vmem:[#allocation0] sm:$0x1] %vm105_vm1, %v104_v48  }
  0x96   :  { %112 = vst.msk [vmem:[#allocation0] sm:$0x1] %vm111_vm2, %v110_v49  }
  0x98   :  { %v116_v50 = vpop.permute.xlu0 %115   ;;  %v122_v51 = vpop.permute.xlu1 %121  }
  0x99   :  { %118 = vst.msk [vmem:[#allocation0] sm:$0x1] %vm117_vm3, %v116_v50  }
  0x9a   :  { %124 = vst.msk [vmem:[#allocation0] sm:$0x1] %vm123_vm4, %v122_v51  }
  0x9c   :  { %v128_v52 = vpop.permute.xlu0 %127   ;;  %v134_v53 = vpop.permute.xlu1 %133  }
  0x9d   :  { %130 = vst.msk [vmem:[#allocation0] sm:$0x1] %vm129_vm5, %v128_v52  }
  0x9e   :  { %136 = vst.msk [vmem:[#allocation0] sm:$0x1] %vm135_vm6, %v134_v53  }
  0xa0   :  { %v140_v54 = vpop.permute.xlu0 %139   ;;  %v146_v55 = vpop.permute.xlu1 %145  }
  0xa1   :  { %142 = vst.msk [vmem:[#allocation0] sm:$0x1] %vm141_vm7, %v140_v54  }
  0xa2   :  { %148 = vst.msk [vmem:[#allocation0] sm:$0x1] %vm147_vm8, %v146_v55  }
  0xa4   :  { %v152_v56 = vpop.permute.xlu0 %151   ;;  %v158_v57 = vpop.permute.xlu1 %157  }
  0xa5   :  { %154 = vst.msk [vmem:[#allocation0] sm:$0x1] %vm153_vm9, %v152_v56  }
  0xa6   :  { %160 = vst.msk [vmem:[#allocation0] sm:$0x1] %vm159_vm10, %v158_v57  }
  0xa8   :  { %v164_v58 = vpop.permute.xlu0 %163   ;;  %v170_v59 = vpop.permute.xlu1 %169  }
  0xa9   :  { %166 = vst.msk [vmem:[#allocation0] sm:$0x1] %vm165_vm11, %v164_v58  }
  0xaa   :  { %172 = vst.msk [vmem:[#allocation0] sm:$0x1] %vm171_vm12, %v170_v59  }
  0xac   :  { %v176_v60 = vpop.permute.xlu0 %175   ;;  %v182_v61 = vpop.permute.xlu1 %181  }
  0xad   :  { %178 = vst.msk [vmem:[#allocation0] sm:$0x1] %vm177_vm13, %v176_v60  }
  0xae   :  { %184 = vst.msk [vmem:[#allocation0] sm:$0x1] %vm183_vm14, %v182_v61  }
  0xb0   :  { %v188_v62 = vpop.permute.xlu0 %187  }
  0xb1   :  { %190 = vst.msk [vmem:[#allocation0] sm:$0x1] %vm189_vm15, %v188_v62  }
  0xb8   :  { %v195_v63 = vld [vmem:[#allocation0] sm:$0x1] }
  0xb9   :  { %198 = vst [vmem:[%s402_s1] sm:$0x1] %v195_v63 }

// kernel: tile.48
= control target key start
LH: loop header
LB: loop body
LE: loop exit
PB: predicated region body
PF: predicated region fallthrough
CT: control target
= control target key end

     0   :  { %s40_s0 = inlined_call_operand.vmem [shape: f32[8], index: 0, kind: input, shape index: {}]   ;;  %s41_s1 = inlined_call_operand.vmem [shape: f32[32,8], index: 1, kind: output, shape index: {}]  }
   0x1   :  { %v4_v0 = vld [vmem:[%s40_s0] ss:$0 sm:$0xff] }
   0x2   :  { %5 = vst [vmem:[%s41_s1] sm:$0xff] %v4_v0  ;;  %12 = vst [vmem:[%s41_s1 + $0x8] sm:$0xff] %v4_v0 }
   0x3   :  { %13 = vst [vmem:[%s41_s1 + $0x10] sm:$0xff] %v4_v0  ;;  %14 = vst [vmem:[%s41_s1 + $0x18] sm:$0xff] %v4_v0 }

// kernel: tile.57
= control target key start
LH: loop header
LB: loop body
LE: loop exit
PB: predicated region body
PF: predicated region fallthrough
CT: control target
= control target key end

     0   :  { %s7_s6 = smov 3  ;;  %s21_s9 = smov 3  ;;  %vm4_vm0 = vcmask 64512   ;;  %vm11_vm1 = vcmask 1048512   ;;  %vm18_vm2 = vcmask 982912   ;;  %vm25_vm3 = vcmask 917312   ;;  %s235_s0 = inlined_call_operand.vmem [shape: f32[32,8], index: 0, kind: input, shape index: {}]   ;;  %s236_s1 = inlined_call_operand.vmem [shape: f32[1,256], index: 1, kind: output, shape index: {}]  }
   0x1   :  { %v125_v0 = vld [vmem:[%s235_s0 + $0xf] ss:$16 sm:%s7_s6]   ;;  %s156_s10 = smov 120   ;;  %v127_v1 = vld [vmem:[%s235_s0 + $0xd] ss:$16 sm:%s21_s9]   ;;  %s14_s13 = smov 3 }
   0x2   :  { %9 = vrot.lane.b32.xlu0 %v125_v0, %s156_s10  ;;  %s157_s14 = smov 104   ;;  %v126_v2 = vld [vmem:[%s235_s0 + $0xe] ss:$16 sm:%s14_s13]   ;;  %s28_s17 = smov 3  ;;  %vm32_vm4 = vcmask 851712   ;;  %vm39_vm5 = vcmask 786112  }
   0x3   :  { %23 = vrot.lane.b32.xlu1 %v127_v1, %s157_s14  ;;  %v128_v3 = vld [vmem:[%s235_s0 + $0xc] ss:$16 sm:%s28_s17]   ;;  %s35_s20 = smov 3  ;;  %s42_s21 = smov 3  ;;  %vm46_vm6 = vcmask 720512   ;;  %vm53_vm7 = vcmask 654912  }
   0x4   :  { %s158_s22 = smov 112   ;;  %s159_s23 = smov 96   ;;  %v129_v4 = vld [vmem:[%s235_s0 + $0xb] ss:$16 sm:%s35_s20]   ;;  %v130_v5 = vld [vmem:[%s235_s0 + $0xa] ss:$16 sm:%s42_s21]  }
   0x5   :  { %s49_s28 = smov 3  ;;  %s56_s29 = smov 3  ;;  %vm60_vm8 = vcmask 589312   ;;  %vm67_vm9 = vcmask 523712   ;;  %vm74_vm10 = vcmask 458112   ;;  %vm81_vm11 = vcmask 392512  }
   0x6   :  { %16 = vrot.lane.b32.xlu0 %v126_v2, %s158_s22  ;;  %s160_s30 = smov 88   ;;  %s161_s2 = smov 80   ;;  %v131_v6 = vld [vmem:[%s235_s0 + $0x9] ss:$16 sm:%s49_s28]   ;;  %vm88_vm12 = vcmask 326912   ;;  %vm95_vm13 = vcmask 261312  }
   0x7   :  { %30 = vrot.lane.b32.xlu1 %v128_v3, %s159_s23  ;;  %v132_v7 = vld [vmem:[%s235_s0 + $0x8] ss:$16 sm:%s56_s29]   ;;  %s63_s7 = smov 3  ;;  %s70_s8 = smov 3  ;;  %vm102_vm14 = vcmask 195712   ;;  %vm109_vm15 = vcmask 130112  }
   0x8   :  { %s162_s9 = smov 72   ;;  %s163_s10 = smov 64   ;;  %v133_v8 = vld [vmem:[%s235_s0 + $0x7] ss:$16 sm:%s63_s7]   ;;  %v134_v9 = vld [vmem:[%s235_s0 + $0x6] ss:$16 sm:%s70_s8]  }
   0x9   :  { %s2_s13 = smov 3  ;;  %s77_s16 = smov 3 }
   0xa   :  { %37 = vrot.lane.b32.xlu0 %v129_v4, %s160_s30  ;;  %v3_v10 = vld [vmem:[%s235_s0] ss:$16 sm:%s2_s13]   ;;  %s84_s19 = smov 3  ;;  %s164_s20 = smov 56  }
   0xb   :  { %44 = vrot.lane.b32.xlu1 %v130_v5, %s161_s2  ;;  %5 = vst.msk [vmem:[#allocation0] ss:$8 sm:$0x3] %vm4_vm0, %v3_v10   ;;  %s165_s21 = smov 48   ;;  %v135_v11 = vld [vmem:[%s235_s0 + $0x5] ss:$16 sm:%s77_s16]  }
   0xc   :  { %v136_v12 = vld [vmem:[%s235_s0 + $0x4] ss:$16 sm:%s84_s19]   ;;  %s91_s26 = smov 3  ;;  %s98_s27 = smov 3 }
   0xd   :  { %s166_s28 = smov 40   ;;  %s167_s29 = smov 32   ;;  %v137_v13 = vld [vmem:[%s235_s0 + $0x3] ss:$16 sm:%s91_s26]   ;;  %v138_v14 = vld [vmem:[%s235_s0 + $0x2] ss:$16 sm:%s98_s27]  }
   0xe   :  { %51 = vrot.lane.b32.xlu0 %v131_v6, %s162_s9  ;;  %s105_s5 = smov 3  ;;  %s168_s6 = smov 24  }
   0xf   :  { %58 = vrot.lane.b32.xlu1 %v132_v7, %s163_s10  ;;  %s169_s7 = smov 16   ;;  %v139_v15 = vld [vmem:[%s235_s0 + $0x1] ss:$16 sm:%s105_s5]   ;;  %s170_s0 = smov 8  }
  0x12   :  { %65 = vrot.lane.b32.xlu0 %v133_v8, %s164_s20 }
  0x13   :  { %72 = vrot.lane.b32.xlu1 %v134_v9, %s165_s21 }
  0x16   :  { %79 = vrot.lane.b32.xlu0 %v135_v11, %s166_s28 }
  0x17   :  { %86 = vrot.lane.b32.xlu1 %v136_v12, %s167_s29 }
  0x1a   :  { %93 = vrot.lane.b32.xlu0 %v137_v13, %s168_s6 }
  0x1b   :  { %100 = vrot.lane.b32.xlu1 %v138_v14, %s169_s7 }
  0x1e   :  { %107 = vrot.lane.b32.xlu0 %v139_v15, %s170_s0 }
  0x74   :  { %v10_v16 = vpop.permute.xlu0 %9  }
  0x75   :  { %12 = vst.msk [vmem:[#allocation0] ss:$8 sm:$0x3] %vm11_vm1, %v10_v16   ;;  %v24_v17 = vpop.permute.xlu1 %23  }
  0x78   :  { %v17_v18 = vpop.permute.xlu0 %16  }
  0x79   :  { %19 = vst.msk [vmem:[#allocation0] ss:$8 sm:$0x3] %vm18_vm2, %v17_v18   ;;  %v31_v19 = vpop.permute.xlu1 %30  }
  0x7a   :  { %26 = vst.msk [vmem:[#allocation0] ss:$8 sm:$0x3] %vm25_vm3, %v24_v17  }
  0x7b   :  { %33 = vst.msk [vmem:[#allocation0] ss:$8 sm:$0x3] %vm32_vm4, %v31_v19  }
  0x7c   :  { %v38_v20 = vpop.permute.xlu0 %37  }
  0x7d   :  { %40 = vst.msk [vmem:[#allocation0] ss:$8 sm:$0x3] %vm39_vm5, %v38_v20   ;;  %v45_v21 = vpop.permute.xlu1 %44  }
  0x7e   :  { %47 = vst.msk [vmem:[#allocation0] ss:$8 sm:$0x3] %vm46_vm6, %v45_v21  }
  0x80   :  { %v52_v22 = vpop.permute.xlu0 %51  }
  0x81   :  { %54 = vst.msk [vmem:[#allocation0] ss:$8 sm:$0x3] %vm53_vm7, %v52_v22   ;;  %v59_v23 = vpop.permute.xlu1 %58  }
  0x82   :  { %61 = vst.msk [vmem:[#allocation0] ss:$8 sm:$0x3] %vm60_vm8, %v59_v23  }
  0x84   :  { %v66_v24 = vpop.permute.xlu0 %65  }
  0x85   :  { %68 = vst.msk [vmem:[#allocation0] ss:$8 sm:$0x3] %vm67_vm9, %v66_v24   ;;  %v73_v25 = vpop.permute.xlu1 %72  }
  0x86   :  { %75 = vst.msk [vmem:[#allocation0] ss:$8 sm:$0x3] %vm74_vm10, %v73_v25  }
  0x88   :  { %v80_v26 = vpop.permute.xlu0 %79  }
  0x89   :  { %82 = vst.msk [vmem:[#allocation0] ss:$8 sm:$0x3] %vm81_vm11, %v80_v26   ;;  %v87_v27 = vpop.permute.xlu1 %86  }
  0x8a   :  { %89 = vst.msk [vmem:[#allocation0] ss:$8 sm:$0x3] %vm88_vm12, %v87_v27  }
  0x8c   :  { %v94_v28 = vpop.permute.xlu0 %93  }
  0x8d   :  { %96 = vst.msk [vmem:[#allocation0] ss:$8 sm:$0x3] %vm95_vm13, %v94_v28   ;;  %v101_v29 = vpop.permute.xlu1 %100  }
  0x8e   :  { %103 = vst.msk [vmem:[#allocation0] ss:$8 sm:$0x3] %vm102_vm14, %v101_v29  }
  0x90   :  { %v108_v30 = vpop.permute.xlu0 %107  }
  0x91   :  { %110 = vst.msk [vmem:[#allocation0] ss:$8 sm:$0x3] %vm109_vm15, %v108_v30  }
  0x98   :  { %v115_v31 = vld [vmem:[#allocation0] sm:$0x1]  ;;  %v120_v32 = vld [vmem:[#allocation0 + $0x8] sm:$0x1] }
  0x99   :  { %118 = vst [vmem:[%s236_s1] sm:$0x1] %v115_v31  ;;  %140 = vst [vmem:[%s236_s1 + $0x1] sm:$0x1] %v120_v32 }

// kernel: conv_mpn_forward.1
= control target key start
LH: loop header
LB: loop body
LE: loop exit
PB: predicated region body
PF: predicated region fallthrough
CT: control target
= control target key end

     0   :  { %v27_v31 = vlaneseq  ;;  %v2514_v51 = vmov 0.0   ;;  %s2516_s15 = smov 16   ;;  %s2517_s16 = smov 32   ;;  %vm2521_vm8 = vmmov 0   ;;  %s3343_s1 = inlined_call_operand.vmem [shape: bf16[768,256], index: 1, kind: input, shape index: {}]   ;;  %s3344_s0 = inlined_call_operand.vmem [shape: f32[16,256], index: 0, kind: input, shape index: {}]   ;;  %s3345_s2 = inlined_call_operand.vmem [shape: f32[3,256], index: 2, kind: input, shape index: {}]   ;;  %s3346_s3 = inlined_call_operand.vmem [shape: bf16[768,128], index: 3, kind: input, shape index: {}]   ;;  %s3347_s4 = inlined_call_operand.vmem [shape: f32[3,128], index: 4, kind: input, shape index: {}]   ;;  %s3348_s5 = inlined_call_operand.vmem [shape: bf16[384,128], index: 5, kind: input, shape index: {}]   ;;  %s3349_s6 = inlined_call_operand.vmem [shape: f32[3,128], index: 6, kind: input, shape index: {}]   ;;  %s3350_s7 = inlined_call_operand.vmem [shape: f32[16,128], index: 7, kind: output, shape index: {}]  }
   0x1   :  { %v2292_v0 = vld [vmem:[%s3343_s1 + $0x74] ss:$8 sps:$4 sm:$0xff]   ;;  %v2294_v1 = vld [vmem:[%s3343_s1 + $0x70] ss:$8 sps:$4 sm:$0xff]   ;;  %v2298_v4 = vld [vmem:[%s3343_s1 + $0x64] ss:$8 sps:$4 sm:$0xff]  }
   0x2   :  { %690 = vmatprep.subr.bf16.mxu0 %v2292_v0  ;;  %v2295_v2 = vld [vmem:[%s3343_s1 + $0x174] ss:$8 sps:$4 sm:$0xff]   ;;  %v2297_v3 = vld [vmem:[%s3343_s1 + $0x170] ss:$8 sps:$4 sm:$0xff]   ;;  %v2300_v5 = vld [vmem:[%s3343_s1 + $0x60] ss:$8 sps:$4 sm:$0xff]  }
   0x3   :  { %691 = vmatpush1.bf16.msra.mxu0 %v2294_v1  ;;  %733 = vmatprep.subr.bf16.mxu1 %v2295_v2  ;;  %v2301_v6 = vld [vmem:[%s3343_s1 + $0x164] ss:$8 sps:$4 sm:$0xff]   ;;  %v2303_v7 = vld [vmem:[%s3343_s1 + $0x160] ss:$8 sps:$4 sm:$0xff]   ;;  %v2304_v8 = vld [vmem:[%s3343_s1 + $0x54] ss:$8 sps:$4 sm:$0xff]  }
   0x4   :  { %734 = vmatpush1.bf16.msra.mxu1 %v2297_v3  ;;  %692 = vmatprep.subr.bf16.mxu0 %v2298_v4  ;;  %v2306_v9 = vld [vmem:[%s3343_s1 + $0x50] ss:$8 sps:$4 sm:$0xff]   ;;  %v2307_v10 = vld [vmem:[%s3343_s1 + $0x154] ss:$8 sps:$4 sm:$0xff]   ;;  %v2310_v11 = vld [vmem:[%s3343_s1 + $0x44] ss:$8 sps:$4 sm:$0xff]  }
   0x5   :  { %735 = vmatprep.subr.bf16.mxu1 %v2301_v6  ;;  %v2309_v12 = vld [vmem:[%s3343_s1 + $0x150] ss:$8 sps:$4 sm:$0xff]   ;;  %v2313_v13 = vld [vmem:[%s3343_s1 + $0x144] ss:$8 sps:$4 sm:$0xff]   ;;  %v2312_v14 = vld [vmem:[%s3343_s1 + $0x40] ss:$8 sps:$4 sm:$0xff]  }
   0x6   :  { %v2316_v15 = vld [vmem:[%s3343_s1 + $0x34] ss:$8 sps:$4 sm:$0xff]   ;;  %v2315_v16 = vld [vmem:[%s3343_s1 + $0x140] ss:$8 sps:$4 sm:$0xff]   ;;  %v2318_v18 = vld [vmem:[%s3343_s1 + $0x30] ss:$8 sps:$4 sm:$0xff]  }
   0x7   :  { %693 = vmatpush1.bf16.msra.mxu0 %v2300_v5  ;;  %v2319_v17 = vld [vmem:[%s3343_s1 + $0x134] ss:$8 sps:$4 sm:$0xff]   ;;  %v2322_v19 = vld [vmem:[%s3343_s1 + $0x24] ss:$8 sps:$4 sm:$0xff]   ;;  %v2321_v20 = vld [vmem:[%s3343_s1 + $0x130] ss:$8 sps:$4 sm:$0xff]  }
   0x8   :  { %694 = vmatprep.subr.bf16.mxu0 %v2304_v8  ;;  %736 = vmatpush1.bf16.msra.mxu1 %v2303_v7  ;;  %v2325_v21 = vld [vmem:[%s3343_s1 + $0x124] ss:$8 sps:$4 sm:$0xff]   ;;  %v2324_v22 = vld [vmem:[%s3343_s1 + $0x20] ss:$8 sps:$4 sm:$0xff]   ;;  %v2328_v23 = vld [vmem:[%s3343_s1 + $0x14] ss:$8 sps:$4 sm:$0xff]  }
   0x9   :  { %737 = vmatprep.subr.bf16.mxu1 %v2307_v10  ;;  %v2327_v24 = vld [vmem:[%s3343_s1 + $0x120] ss:$8 sps:$4 sm:$0xff]   ;;  %v2331_v25 = vld [vmem:[%s3343_s1 + $0x114] ss:$8 sps:$4 sm:$0xff]   ;;  %v2330_v26 = vld [vmem:[%s3343_s1 + $0x10] ss:$8 sps:$4 sm:$0xff]  }
   0xa   :  { %v2334_v27 = vld [vmem:[%s3343_s1 + $0x4] ss:$8 sps:$4 sm:$0xff]   ;;  %v2333_v28 = vld [vmem:[%s3343_s1 + $0x110] ss:$8 sps:$4 sm:$0xff]   ;;  %v2336_v30 = vld [vmem:[%s3343_s1] ss:$8 sps:$4 sm:$0xff]  }
   0xb   :  { %695 = vmatpush1.bf16.msra.mxu0 %v2306_v9  ;;  %v2337_v29 = vld [vmem:[%s3343_s1 + $0x104] ss:$8 sps:$4 sm:$0xff]   ;;  %v2340_v32 = vld [vmem:[%s3343_s1 + $0xf4] ss:$8 sps:$4 sm:$0xff]   ;;  %v2339_v33 = vld [vmem:[%s3343_s1 + $0x100] ss:$8 sps:$4 sm:$0xff]  }
   0xc   :  { %696 = vmatprep.subr.bf16.mxu0 %v2310_v11  ;;  %738 = vmatpush1.bf16.msra.mxu1 %v2309_v12  ;;  %v2343_v34 = vld [vmem:[%s3343_s1 + $0x1f4] ss:$8 sps:$4 sm:$0xff]   ;;  %v2342_v35 = vld [vmem:[%s3343_s1 + $0xf0] ss:$8 sps:$4 sm:$0xff]   ;;  %v2668_v36 = vshrl.u32 %v27_v31, 7  ;;  %v2711_v53 = vld [vmem:[%s3344_s0 + $0x8] sm:$0xff] }
   0xd   :  { %739 = vmatprep.subr.bf16.mxu1 %v2313_v13  ;;  %v2346_v37 = vld [vmem:[%s3343_s1 + $0xe4] ss:$8 sps:$4 sm:$0xff]   ;;  %v2345_v38 = vld [vmem:[%s3343_s1 + $0x1f0] ss:$8 sps:$4 sm:$0xff]   ;;  %v2348_v40 = vld [vmem:[%s3343_s1 + $0xe0] ss:$8 sps:$4 sm:$0xff]  }
   0xe   :  { %v2349_v39 = vld [vmem:[%s3343_s1 + $0x1e4] ss:$8 sps:$4 sm:$0xff]   ;;  %v34_v41 = vand.u32 15, %v2668_v36  ;;  %v2352_v42 = vld [vmem:[%s3343_s1 + $0xd4] ss:$8 sps:$4 sm:$0xff]   ;;  %v29_v43 = vadd.s32 8, %v2668_v36 }
   0xf   :  { %697 = vmatpush1.bf16.msra.mxu0 %v2312_v14  ;;  %v2351_v44 = vld [vmem:[%s3343_s1 + $0x1e0] ss:$8 sps:$4 sm:$0xff]   ;;  %v2355_v45 = vld [vmem:[%s3343_s1 + $0x1d4] ss:$8 sps:$4 sm:$0xff]   ;;  %v2354_v46 = vld [vmem:[%s3343_s1 + $0xd0] ss:$8 sps:$4 sm:$0xff]  }
  0x10   :  { %698 = vmatprep.subr.bf16.mxu0 %v2316_v15  ;;  %740 = vmatpush1.bf16.msra.mxu1 %v2315_v16  ;;  %vm54_vm0 = vcmp.ne.s32.totalorder %v34_v41, 0  ;;  %v2358_v47 = vld [vmem:[%s3343_s1 + $0xc4] ss:$8 sps:$4 sm:$0xff]   ;;  %v41_v48 = vand.u32 15, %v29_v43  ;;  %v2357_v49 = vld [vmem:[%s3343_s1 + $0x1d0] ss:$8 sps:$4 sm:$0xff]  }
  0x11   :  { %741 = vmatprep.subr.bf16.mxu1 %v2319_v17  ;;  %v2361_v50 = vld [vmem:[%s3343_s1 + $0x1c4] ss:$8 sps:$4 sm:$0xff]   ;;  %v2706_v52 = vsel %vm54_vm0, 1.0, %v2514_v51  ;;  %v2716_v54 = vld [vmem:[%s3344_s0 + $0x18] sm:$0xff]  ;;  %vm74_vm1 = vcmp.lt.s32.totalorder %v2668_v36, 1  ;;  %v71_v57 = vrot.slane %v2711_v53, 7 }
  0x12   :  { %v2360_v55 = vld [vmem:[%s3343_s1 + $0xc0] ss:$8 sps:$4 sm:$0xff]   ;;  %v73_v58 = vrot.slane %v2716_v54, 7  ;;  %v99_v59 = vpack.c.bf16 %v2716_v54, %v2711_v53  ;;  %v2364_v60 = vld [vmem:[%s3343_s1 + $0xb4] ss:$8 sps:$4 sm:$0xff]   ;;  %vm61_vm2 = vcmp.ne.s32.totalorder %v41_v48, 15 }
  0x13   :  { %699 = vmatpush1.bf16.msra.mxu0 %v2318_v18  ;;  %v2363_v56 = vld [vmem:[%s3343_s1 + $0x1c0] ss:$8 sps:$4 sm:$0xff]   ;;  %v2367_v0 = vld [vmem:[%s3343_s1 + $0x1b4] ss:$8 sps:$4 sm:$0xff]   ;;  %vm87_vm3 = vcmp.lt.s32.totalorder %v2668_v36, 7  ;;  %v2756_v5 = vsel %vm61_vm2, 1.0, %v2514_v51 }
  0x14   :  { %700 = vmatprep.subr.bf16.mxu0 %v2322_v19  ;;  %742 = vmatpush1.bf16.msra.mxu1 %v2321_v20  ;;  %v76_v61 = vsel %vm74_vm1, %v71_v57, %v73_v58  ;;  %v78_v62 = vsel %vm74_vm1, %v73_v58, %v71_v57  ;;  %v2739_v63 = vld [vmem:[%s3344_s0] sm:$0xff]  ;;  %v2748_v2 = vld [vmem:[%s3344_s0 + $0x10] sm:$0xff]  ;;  %v84_v18 = vrot.slane %v2711_v53, 1  ;;  %v86_v19 = vrot.slane %v2716_v54, 1  ;;  %s2518_s17 = smov 64  }
  0x15   :  { %743 = vmatprep.subr.bf16.mxu1 %v2325_v21  ;;  %765 = vmatprep.mubr.bf16.mxu1 %v99_v59  ;;  %v80_v1 = vmul.f32 %v2706_v52, %v78_v62  ;;  %v83_v3 = vrot.slane %v2739_v63, 1  ;;  %v2366_v4 = vld [vmem:[%s3343_s1 + $0xb0] ss:$8 sps:$4 sm:$0xff]   ;;  %v85_v6 = vrot.slane %v2748_v2, 1  ;;  %v2370_v7 = vld [vmem:[%s3343_s1 + $0xa4] ss:$8 sps:$4 sm:$0xff]   ;;  %v98_v41 = vpack.c.bf16 %v2748_v2, %v2739_v63 }
  0x16   :  { %v2369_v9 = vld [vmem:[%s3343_s1 + $0x1b0] ss:$8 sps:$4 sm:$0xff]   ;;  %v2373_v12 = vld [vmem:[%s3343_s1 + $0x1a4] ss:$8 sps:$4 sm:$0xff]   ;;  %v2372_v14 = vld [vmem:[%s3343_s1 + $0xa0] ss:$8 sps:$4 sm:$0xff]  }
  0x17   :  { %701 = vmatpush1.bf16.msra.mxu0 %v2324_v22  ;;  %v97_v8 = vpack.c.bf16 %v76_v61, %v80_v1  ;;  %v2767_v10 = vsel %vm87_vm3, %v83_v3, %v85_v6  ;;  %v90_v11 = vsel %vm87_vm3, %v85_v6, %v83_v3  ;;  %v70_v15 = vrot.slane %v2739_v63, 7  ;;  %v2376_v17 = vld [vmem:[%s3343_s1 + $0x94] ss:$8 sps:$4 sm:$0xff]   ;;  %v2375_v21 = vld [vmem:[%s3343_s1 + $0x1a0] ss:$8 sps:$4 sm:$0xff]  }
  0x18   :  { %702 = vmatprep.subr.bf16.mxu0 %v2328_v23  ;;  %744 = vmatpush1.bf16.msra.mxu1 %v2327_v24  ;;  %v2775_v13 = vmul.f32 %v2756_v5, %v90_v11  ;;  %v72_v16 = vrot.slane %v2748_v2, 7  ;;  %v2379_v22 = vld [vmem:[%s3343_s1 + $0x194] ss:$8 sps:$4 sm:$0xff]   ;;  %v2378_v23 = vld [vmem:[%s3343_s1 + $0x90] ss:$8 sps:$4 sm:$0xff]  }
  0x19   :  { %745 = vmatprep.subr.bf16.mxu1 %v2331_v25  ;;  %722 = vmatprep.mubr.bf16.mxu0 %v97_v8  ;;  %v2382_v25 = vld [vmem:[%s3343_s1 + $0x84] ss:$8 sps:$4 sm:$0xff]   ;;  %v2391_v43 = vld [vmem:[%s3343_s1 + $0x260] ss:$8 sps:$4 sm:$0xff]   ;;  %v2402_v48 = vld [vmem:[%s3343_s1 + $0x234] ss:$8 sps:$4 sm:$0xff]  }
  0x1a   :  { %v100_v20 = vpack.c.bf16 %v2775_v13, %v2767_v10  ;;  %v77_v24 = vsel %vm74_vm1, %v72_v16, %v70_v15  ;;  %v2403_v53 = vld [vmem:[%s3343_s1 + $0x220] ss:$8 sps:$4 sm:$0xff]   ;;  %v2408_v54 = vld [vmem:[%s3343_s1 + $0x214] ss:$8 sps:$4 sm:$0xff]   ;;  %v2412_v59 = vld [vmem:[%s3343_s1 + $0x2f0] ss:$8 sps:$4 sm:$0xff]  }
  0x1b   :  { %703 = vmatpush1.bf16.msra.mxu0 %v2330_v26  ;;  %v91_v26 = vsel %vm87_vm3, %v86_v19, %v84_v18  ;;  %v2409_v57 = vld [vmem:[%s3343_s1 + $0x200] ss:$8 sps:$4 sm:$0xff]   ;;  %v2414_v58 = vld [vmem:[%s3343_s1 + $0x2f4] ss:$8 sps:$4 sm:$0xff]   ;;  %v2418_v63 = vld [vmem:[%s3343_s1 + $0x2d0] ss:$8 sps:$4 sm:$0xff]  }
  0x1c   :  { %704 = vmatprep.subr.bf16.mxu0 %v2334_v27  ;;  %746 = vmatpush1.bf16.msra.mxu1 %v2333_v28  ;;  %v2381_v27 = vld [vmem:[%s3343_s1 + $0x190] ss:$8 sps:$4 sm:$0xff]   ;;  %v2385_v28 = vld [vmem:[%s3343_s1 + $0x184] ss:$8 sps:$4 sm:$0xff]   ;;  %v2415_v61 = vld [vmem:[%s3343_s1 + $0x2e0] ss:$8 sps:$4 sm:$0xff]  }
  0x1d   :  { %747 = vmatprep.subr.bf16.mxu1 %v2337_v29  ;;  %v79_v29 = vmul.f32 %v2706_v52, %v77_v24  ;;  %v2420_v62 = vld [vmem:[%s3343_s1 + $0x2d4] ss:$8 sps:$4 sm:$0xff]   ;;  %v2421_v1 = vld [vmem:[%s3343_s1 + $0x2c0] ss:$8 sps:$4 sm:$0xff]   ;;  %v2424_v3 = vld [vmem:[%s3343_s1 + $0x2b0] ss:$8 sps:$4 sm:$0xff]  }
  0x1e   :  { %v2426_v2 = vld [vmem:[%s3343_s1 + $0x2b4] ss:$8 sps:$4 sm:$0xff]   ;;  %v2427_v6 = vld [vmem:[%s3343_s1 + $0x2a0] ss:$8 sps:$4 sm:$0xff]   ;;  %v2430_v8 = vld [vmem:[%s3343_s1 + $0x290] ss:$8 sps:$4 sm:$0xff]  }
  0x1f   :  { %705 = vmatpush1.bf16.msra.mxu0 %v2336_v30  ;;  %v2384_v30 = vld [vmem:[%s3343_s1 + $0x80] ss:$8 sps:$4 sm:$0xff]  }
  0x20   :  { %706 = vmatprep.subr.bf16.mxu0 %v2340_v32  ;;  %748 = vmatpush1.bf16.msra.mxu1 %v2339_v33  ;;  %v75_v32 = vsel %vm74_vm1, %v70_v15, %v72_v16  ;;  %v95_v33 = vmul.f32 %v2756_v5, %v91_v26  ;;  %v2433_v11 = vld [vmem:[%s3343_s1 + $0x280] ss:$8 sps:$4 sm:$0xff]   ;;  %v2931_v16 = vsub.s32 1, %v2668_v36 }
  0x21   :  { %749 = vmatprep.subr.bf16.mxu1 %v2343_v34  ;;  %v2390_v34 = vld [vmem:[%s3343_s1 + $0x274] ss:$8 sps:$4 sm:$0xff]   ;;  %v198_v15 = vld [vmem:[%s3345_s2] ss:$4 sm:$0x3] }
  0x23   :  { %707 = vmatpush2.bf16.msra.mxu0 %v2342_v35  ;;  %v89_v35 = vsel %vm87_vm3, %v84_v18, %v86_v19 }
  0x24   :  { %708 = vmatprep.subr.bf16.mxu0 %v2346_v37  ;;  %750 = vmatpush2.bf16.msra.mxu1 %v2345_v38  ;;  %v2387_v37 = vld [vmem:[%s3343_s1 + $0x180] ss:$8 sps:$4 sm:$0xff]   ;;  %v96_v38 = vpack.c.bf16 %v75_v32, %v79_v29 }
  0x25   :  { %751 = vmatprep.subr.bf16.mxu1 %v2349_v39  ;;  %v2388_v39 = vld [vmem:[%s3343_s1 + $0x270] ss:$8 sps:$4 sm:$0xff]  }
  0x27   :  { %709 = vmatpush2.bf16.msra.mxu0 %v2348_v40  ;;  %v101_v40 = vpack.c.bf16 %v95_v33, %v89_v35 }
  0x28   :  { %710 = vmatprep.subr.bf16.mxu0 %v2352_v42  ;;  %752 = vmatpush2.bf16.msra.mxu1 %v2351_v44  ;;  %v2393_v42 = vld [vmem:[%s3343_s1 + $0x264] ss:$8 sps:$4 sm:$0xff]   ;;  %v2396_v44 = vld [vmem:[%s3343_s1 + $0x254] ss:$8 sps:$4 sm:$0xff]  }
  0x29   :  { %753 = vmatprep.subr.bf16.mxu1 %v2355_v45  ;;  %v2394_v45 = vld [vmem:[%s3343_s1 + $0x250] ss:$8 sps:$4 sm:$0xff]  }
  0x2b   :  { %711 = vmatpush2.bf16.msra.mxu0 %v2354_v46  ;;  %v2399_v46 = vld [vmem:[%s3343_s1 + $0x244] ss:$8 sps:$4 sm:$0xff]  }
  0x2c   :  { %712 = vmatprep.subr.bf16.mxu0 %v2358_v47  ;;  %754 = vmatpush2.bf16.msra.mxu1 %v2357_v49  ;;  %v2397_v47 = vld [vmem:[%s3343_s1 + $0x240] ss:$8 sps:$4 sm:$0xff]   ;;  %v2400_v49 = vld [vmem:[%s3343_s1 + $0x230] ss:$8 sps:$4 sm:$0xff]  }
  0x2d   :  { %755 = vmatprep.subr.bf16.mxu1 %v2361_v50  ;;  %v2405_v50 = vld [vmem:[%s3343_s1 + $0x224] ss:$8 sps:$4 sm:$0xff]  }
  0x2f   :  { %713 = vmatpush2.bf16.msra.mxu0 %v2360_v55  ;;  %v2406_v55 = vld [vmem:[%s3343_s1 + $0x210] ss:$8 sps:$4 sm:$0xff]  }
  0x30   :  { %714 = vmatprep.subr.bf16.mxu0 %v2364_v60  ;;  %756 = vmatpush2.bf16.msra.mxu1 %v2363_v56  ;;  %v2411_v56 = vld [vmem:[%s3343_s1 + $0x204] ss:$8 sps:$4 sm:$0xff]  }
  0x31   :  { %757 = vmatprep.subr.bf16.mxu1 %v2367_v0  ;;  %v2417_v60 = vld [vmem:[%s3343_s1 + $0x2e4] ss:$8 sps:$4 sm:$0xff]  }
  0x32   :  { %v2423_v0 = vld [vmem:[%s3343_s1 + $0x2c4] ss:$8 sps:$4 sm:$0xff]  }
  0x33   :  { %715 = vmatpush2.bf16.msra.mxu0 %v2366_v4  ;;  %v2429_v4 = vld [vmem:[%s3343_s1 + $0x2a4] ss:$8 sps:$4 sm:$0xff]  }
  0x34   :  { %716 = vmatprep.subr.bf16.mxu0 %v2370_v7  ;;  %758 = vmatpush2.bf16.msra.mxu1 %v2369_v9  ;;  %v2432_v7 = vld [vmem:[%s3343_s1 + $0x294] ss:$8 sps:$4 sm:$0xff]   ;;  %v2435_v9 = vld [vmem:[%s3343_s1 + $0x284] ss:$8 sps:$4 sm:$0xff]   ;;  %s2515_s1 = smov 8  }
  0x35   :  { %759 = vmatprep.subr.bf16.mxu1 %v2373_v12 }
  0x37   :  { %717 = vmatpush2.bf16.msra.mxu0 %v2372_v14  ;;  %v2925_v14 = vsub.s32 0, %v2668_v36 }
  0x38   :  { %718 = vmatprep.subr.bf16.mxu0 %v2376_v17  ;;  %760 = vmatpush2.bf16.msra.mxu1 %v2375_v21  ;;  %v207_v21 = vrot.slane %v198_v15, %v2931_v16 }
  0x39   :  { %761 = vmatprep.subr.bf16.mxu1 %v2379_v22  ;;  %v203_v19 = vrot.slane %v198_v15, %v2925_v14 }
  0x3b   :  { %719 = vmatpush2.bf16.msra.mxu0 %v2378_v23 }
  0x3c   :  { %720 = vmatprep.subr.bf16.mxu0 %v2382_v25  ;;  %762 = vmatpush2.bf16.msra.mxu1 %v2381_v27 }
  0x3d   :  { %763 = vmatprep.subr.bf16.mxu1 %v2385_v28 }
  0x3f   :  { %721 = vmatpush2.bf16.msra.mxu0 %v2384_v30 }
  0x40   :  { %776 = vmatprep.subr.bf16.mxu0 %v2390_v34  ;;  %764 = vmatpush2.bf16.msra.mxu1 %v2387_v37 }
  0x42   :  { %723 = vmatmul.mubr.bf16.vlgmr.msra.gmra.mxu0 %v96_v38 }
  0x43   :  { %777 = vmatpush1.bf16.msra.mxu0 %v2388_v39  ;;  %808 = vmatprep.mubr.bf16.mxu0 %v101_v40 }
  0x44   :  { %766 = vmatmul.mubr.bf16.vlgmr.msra.gmra.mxu1 %v98_v41  ;;  %778 = vmatprep.subr.bf16.mxu0 %v2393_v42 }
  0x47   :  { %779 = vmatpush1.bf16.msra.mxu0 %v2391_v43 }
  0x48   :  { %780 = vmatprep.subr.bf16.mxu0 %v2396_v44 }
  0x4b   :  { %781 = vmatpush1.bf16.msra.mxu0 %v2394_v45 }
  0x4c   :  { %782 = vmatprep.subr.bf16.mxu0 %v2399_v46 }
  0x4f   :  { %783 = vmatpush1.bf16.msra.mxu0 %v2397_v47 }
  0x50   :  { %784 = vmatprep.subr.bf16.mxu0 %v2402_v48 }
  0x53   :  { %785 = vmatpush1.bf16.msra.mxu0 %v2400_v49 }
  0x54   :  { %786 = vmatprep.subr.bf16.mxu0 %v2405_v50 }
  0x57   :  { %787 = vmatpush1.bf16.msra.mxu0 %v2403_v53 }
  0x58   :  { %788 = vmatprep.subr.bf16.mxu0 %v2408_v54 }
  0x5b   :  { %789 = vmatpush1.bf16.msra.mxu0 %v2406_v55 }
  0x5c   :  { %790 = vmatprep.subr.bf16.mxu0 %v2411_v56 }
  0x5f   :  { %791 = vmatpush1.bf16.msra.mxu0 %v2409_v57 }
  0x60   :  { %792 = vmatprep.subr.bf16.mxu0 %v2414_v58 }
  0x63   :  { %793 = vmatpush2.bf16.msra.mxu0 %v2412_v59 }
  0x64   :  { %794 = vmatprep.subr.bf16.mxu0 %v2417_v60 }
  0x67   :  { %795 = vmatpush2.bf16.msra.mxu0 %v2415_v61 }
  0x68   :  { %796 = vmatprep.subr.bf16.mxu0 %v2420_v62 }
  0x6b   :  { %797 = vmatpush2.bf16.msra.mxu0 %v2418_v63 }
  0x6c   :  { %798 = vmatprep.subr.bf16.mxu0 %v2423_v0 }
  0x6f   :  { %799 = vmatpush2.bf16.msra.mxu0 %v2421_v1 }
  0x70   :  { %800 = vmatprep.subr.bf16.mxu0 %v2426_v2 }
  0x73   :  { %801 = vmatpush2.bf16.msra.mxu0 %v2424_v3 }
  0x74   :  { %802 = vmatprep.subr.bf16.mxu0 %v2429_v4 }
  0x77   :  { %803 = vmatpush2.bf16.msra.mxu0 %v2427_v6 }
  0x78   :  { %804 = vmatprep.subr.bf16.mxu0 %v2432_v7 }
  0x7b   :  { %805 = vmatpush2.bf16.msra.mxu0 %v2430_v8 }
  0x7c   :  { %806 = vmatprep.subr.bf16.mxu0 %v2435_v9 }
  0x7f   :  { %807 = vmatpush2.bf16.msra.mxu0 %v2433_v11 }
  0x82   :  { %809 = vmatmul.mubr.bf16.vlgmr.msra.gmra.mxu0 %v100_v20 }
 0x102   :  { %v724_v12 = vpop.f32.mrf.mxu0 }
 0x103   :  { %v725_v13 = vadd.f32 %v724_v12, %v203_v19 }
 0x104   :  { %v726_v17 = vpop.f32.mrf.mxu0  ;;  %v767_v18 = vpop.f32.mrf.mxu1 }
 0x105   :  { %v727_v20 = vadd.f32 %v726_v17, %v207_v21  ;;  %v768_v25 = vadd.f32 %v767_v18, %v725_v13 }
 0x106   :  { %v728_v22 = vpop.f32.mrf.mxu0  ;;  %v769_v10 = vpop.f32.mrf.mxu1 }
 0x107   :  { %v729_v26 = vadd.f32 %v728_v22, %v203_v19  ;;  %v770_v28 = vadd.f32 %v769_v10, %v727_v20  ;;  %v2960_v22 = vand.u32 127, %v27_v31 }
 0x108   :  { %v730_v23 = vpop.f32.mrf.mxu0  ;;  %v771_v24 = vpop.f32.mrf.mxu1 }
 0x109   :  { %v731_v29 = vadd.f32 %v730_v23, %v207_v21  ;;  %v772_v34 = vadd.f32 %v771_v24, %v729_v26  ;;  %vm861_vm4 = vcmp.lt.s32.totalorder %v2960_v22, 8  ;;  %vm878_vm5 = vcmp.lt.s32.totalorder %v2960_v22, 16 }
 0x10a   :  { %v773_v32 = vpop.f32.mrf.mxu1  ;;  %vm895_vm6 = vcmp.lt.s32.totalorder %v2960_v22, 32  ;;  %vm912_vm7 = vcmp.lt.s32.totalorder %v2960_v22, 64 }
 0x10b   :  { %v774_v38 = vadd.f32 %v773_v32, %v731_v29 }
 0x142   :  { %v810_v27 = vpop.f32.mrf.mxu0 }
 0x143   :  { %v811_v30 = vadd.f32 %v810_v27, %v768_v25 }
 0x144   :  { %v812_v33 = vpop.f32.mrf.mxu0 }
 0x145   :  { %v813_v35 = vadd.f32 %v812_v33, %v770_v28  ;;  %v2935_v39 = vmax.f32 %v811_v30, 0.0 }
 0x146   :  { %v814_v37 = vpop.f32.mrf.mxu0 }
 0x147   :  { %v815_v40 = vadd.f32 %v814_v37, %v772_v34  ;;  %v2937_v41 = vmax.f32 %v813_v35, 0.0  ;;  %v837_v45 = vmul.f32 %v2935_v39, %v2935_v39 }
 0x148   :  { %v816_v42 = vpop.f32.mrf.mxu0 }
 0x149   :  { %v2939_v43 = vmax.f32 %v815_v40, 0.0  ;;  %v817_v44 = vadd.f32 %v816_v42, %v774_v38  ;;  %v838_v49 = vmul.f32 %v2937_v41, %v2937_v41 }
 0x14b   :  { %v823_v46 = vadd.f32 %v2939_v43, %v2935_v39  ;;  %v839_v47 = vmul.f32 %v2939_v43, %v2939_v43  ;;  %v2947_v48 = vmax.f32 %v817_v44, 0.0 }
 0x14d   :  { %v830_v50 = vadd.f32 %v2947_v48, %v2937_v41  ;;  %v840_v53 = vmul.f32 %v2947_v48, %v2947_v48  ;;  %v824_v54 = vrot.slane %v823_v46, 4  ;;  %v841_v55 = vadd.f32 %v839_v47, %v837_v45 }
 0x14f   :  { %v831_v56 = vrot.slane %v830_v50, 4  ;;  %v848_v57 = vadd.f32 %v840_v53, %v838_v49  ;;  %v825_v58 = vadd.f32 %v824_v54, %v823_v46  ;;  %v842_v59 = vrot.slane %v841_v55, 4 }
 0x151   :  { %v832_v60 = vadd.f32 %v831_v56, %v830_v50  ;;  %v849_v61 = vrot.slane %v848_v57, 4  ;;  %v826_v62 = vrot.slane %v825_v58, 2  ;;  %v843_v63 = vadd.f32 %v842_v59, %v841_v55 }
 0x153   :  { %v827_v0 = vadd.f32 %v826_v62, %v825_v58  ;;  %v844_v1 = vrot.slane %v843_v63, 2  ;;  %v833_v2 = vrot.slane %v832_v60, 2  ;;  %v850_v3 = vadd.f32 %v849_v61, %v848_v57 }
 0x155   :  { %v828_v4 = vrot.slane %v827_v0, 1  ;;  %v845_v6 = vadd.f32 %v844_v1, %v843_v63  ;;  %v834_v7 = vadd.f32 %v833_v2, %v832_v60  ;;  %v851_v8 = vrot.slane %v850_v3, 2  ;;  %v2436_v63 = vld [vmem:[%s3346_s3 + $0x78] sm:$0xff]  }
 0x156   :  { %2167 = vmatprep.subr.bf16.mxu1 %v2436_v63  ;;  %v2438_v1 = vld [vmem:[%s3346_s3 + $0x178] sm:$0xff]  }
 0x157   :  { %v829_v9 = vadd.f32 %v828_v4, %v827_v0  ;;  %v846_v11 = vrot.slane %v845_v6, 1  ;;  %v835_v12 = vrot.slane %v834_v7, 1  ;;  %v852_v15 = vadd.f32 %v851_v8, %v850_v3  ;;  %v2437_v0 = vld [vmem:[%s3346_s3 + $0x38] sm:$0xff]   ;;  %2211 = vmatprep.subr.bf16.mxu0 %v2438_v1  ;;  %v2440_v3 = vld [vmem:[%s3346_s3 + $0x70] sm:$0xff]   ;;  %v2444_v8 = vld [vmem:[%s3346_s3 + $0x68] sm:$0xff]  }
 0x158   :  { %2168 = vmatpush3.bf16.msra.mxu1 %v2437_v0  ;;  %v2439_v2 = vld [vmem:[%s3346_s3 + $0x138] sm:$0xff]   ;;  %v2441_v4 = vld [vmem:[%s3346_s3 + $0x30] sm:$0xff]  }
 0x159   :  { %855 = vrot.lane.b32.xlu0 %v829_v9, %s2515_s1  ;;  %v847_v17 = vadd.f32 %v846_v11, %v845_v6  ;;  %v853_v18 = vrot.slane %v852_v15, 1  ;;  %v836_v19 = vadd.f32 %v835_v12, %v834_v7  ;;  %2212 = vmatpush3.bf16.msra.mxu0 %v2439_v2  ;;  %v2442_v6 = vld [vmem:[%s3346_s3 + $0x170] sm:$0xff]   ;;  %v2446_v11 = vld [vmem:[%s3346_s3 + $0x168] sm:$0xff]  }
 0x15a   :  { %2169 = vmatprep.subr.bf16.mxu1 %v2440_v3  ;;  %v2443_v7 = vld [vmem:[%s3346_s3 + $0x130] sm:$0xff]   ;;  %2213 = vmatprep.subr.bf16.mxu0 %v2442_v6  ;;  %v2447_v12 = vld [vmem:[%s3346_s3 + $0x128] sm:$0xff]  }
 0x15b   :  { %866 = vrot.lane.b32.xlu1 %v847_v17, %s2515_s1  ;;  %v854_v21 = vadd.f32 %v853_v18, %v852_v15  ;;  %v2448_v15 = vld [vmem:[%s3346_s3 + $0x60] sm:$0xff]  }
 0x15c   :  { %2170 = vmatpush3.bf16.msra.mxu1 %v2441_v4  ;;  %v2450_v18 = vld [vmem:[%s3346_s3 + $0x160] sm:$0xff]  }
 0x15d   :  { %857 = vrot.lane.b32.xlu0 %v836_v19, %s2515_s1  ;;  %2214 = vmatpush3.bf16.msra.mxu0 %v2443_v7 }
 0x15e   :  { %2171 = vmatprep.subr.bf16.mxu1 %v2444_v8  ;;  %2215 = vmatprep.subr.bf16.mxu0 %v2446_v11 }
 0x15f   :  { %868 = vrot.lane.b32.xlu1 %v854_v21, %s2515_s1 }
 0x161   :  { %2216 = vmatpush3.bf16.msra.mxu0 %v2447_v12 }
 0x162   :  { %2217 = vmatprep.subr.bf16.mxu0 %v2450_v18 }
 0x1cb   :  { %v856_v10 = vpop.permute.xlu0 %855 }
 0x1cd   :  { %v867_v13 = vpop.permute.xlu1 %866 }
 0x1cf   :  { %v858_v20 = vpop.permute.xlu0 %857 }
 0x1d0   :  { %v862_v23 = vsel %vm861_vm4, %v856_v10, %v858_v20  ;;  %v863_v24 = vsel %vm861_vm4, %v858_v20, %v856_v10  ;;  %v2453_v10 = vld [vmem:[%s3346_s3 + $0x18] sm:$0xff]  }
 0x1d1   :  { %v864_v25 = vadd.f32 %v863_v24, %v829_v9  ;;  %v865_v26 = vadd.f32 %v862_v23, %v836_v19  ;;  %v869_v27 = vpop.permute.xlu1 %868  ;;  %v2445_v9 = vld [vmem:[%s3346_s3 + $0x28] sm:$0xff]   ;;  %v2451_v19 = vld [vmem:[%s3346_s3 + $0x120] sm:$0xff]   ;;  %v2455_v20 = vld [vmem:[%s3346_s3 + $0x118] sm:$0xff]  }
 0x1d2   :  { %v870_v28 = vsel %vm861_vm4, %v867_v13, %v869_v27  ;;  %v871_v29 = vsel %vm861_vm4, %v869_v27, %v867_v13  ;;  %2172 = vmatpush3.bf16.msra.mxu1 %v2445_v9  ;;  %2218 = vmatpush3.bf16.msra.mxu0 %v2451_v19  ;;  %v2454_v13 = vld [vmem:[%s3346_s3 + $0x158] sm:$0xff]   ;;  %v2456_v23 = vld [vmem:[%s3346_s3 + $0x50] sm:$0xff]   ;;  %v2460_v27 = vld [vmem:[%s3346_s3 + $0x48] sm:$0xff]  }
 0x1d3   :  { %874 = vrot.lane.b32.xlu0 %v864_v25, %s2516_s15  ;;  %876 = vrot.lane.b32.xlu1 %v865_v26, %s2516_s15  ;;  %v872_v30 = vadd.f32 %v871_v29, %v847_v17  ;;  %v873_v31 = vadd.f32 %v870_v28, %v854_v21  ;;  %v2449_v17 = vld [vmem:[%s3346_s3 + $0x20] sm:$0xff]   ;;  %v2452_v21 = vld [vmem:[%s3346_s3 + $0x58] sm:$0xff]  }
 0x1d4   :  { %2173 = vmatprep.subr.bf16.mxu1 %v2448_v15  ;;  %2219 = vmatprep.subr.bf16.mxu0 %v2454_v13  ;;  %v2457_v24 = vld [vmem:[%s3346_s3 + $0x10] sm:$0xff]   ;;  %v2461_v28 = vld [vmem:[%s3346_s3 + $0x8] sm:$0xff]   ;;  %v2092_v19 = vld [vmem:[%s3345_s2 + $0x2] ss:$4 sm:$0x3] }
 0x1d5   :  { %v2462_v29 = vld [vmem:[%s3346_s3 + $0x148] sm:$0xff]  }
 0x1d6   :  { %2174 = vmatpush3.bf16.msra.mxu1 %v2449_v17  ;;  %2220 = vmatpush3.bf16.msra.mxu0 %v2455_v20 }
 0x1d7   :  { %883 = vrot.lane.b32.xlu0 %v872_v30, %s2516_s15  ;;  %885 = vrot.lane.b32.xlu1 %v873_v31, %s2516_s15 }
 0x1d8   :  { %2175 = vmatprep.subr.bf16.mxu1 %v2452_v21 }
 0x1da   :  { %2176 = vmatpush3.bf16.msra.mxu1 %v2453_v10 }
 0x1db   :  { %2177 = vmatprep.subr.bf16.mxu1 %v2456_v23 }
 0x1de   :  { %2178 = vmatpush3.bf16.msra.mxu1 %v2457_v24 }
 0x1df   :  { %2179 = vmatprep.subr.bf16.mxu1 %v2460_v27 }
 0x1e2   :  { %2180 = vmatpush3.bf16.msra.mxu1 %v2461_v28 }
 0x245   :  { %v875_v32 = vpop.permute.xlu0 %874  ;;  %v877_v33 = vpop.permute.xlu1 %876 }
 0x246   :  { %v879_v34 = vsel %vm878_vm5, %v875_v32, %v877_v33  ;;  %v880_v35 = vsel %vm878_vm5, %v877_v33, %v875_v32  ;;  %v2465_v32 = vld [vmem:[%s3346_s3] sm:$0xff]  }
 0x247   :  { %v881_v37 = vadd.f32 %v880_v35, %v864_v25  ;;  %v882_v38 = vadd.f32 %v879_v34, %v865_v26  ;;  %v2458_v25 = vld [vmem:[%s3346_s3 + $0x150] sm:$0xff]   ;;  %v2466_v33 = vld [vmem:[%s3346_s3 + $0x140] sm:$0xff]   ;;  %v2468_v35 = vld [vmem:[%s3346_s3 + $0xf8] sm:$0xff]  }
 0x248   :  { %v2459_v26 = vld [vmem:[%s3346_s3 + $0x110] sm:$0xff]   ;;  %2221 = vmatprep.subr.bf16.mxu0 %v2458_v25  ;;  %v2467_v34 = vld [vmem:[%s3346_s3 + $0x100] sm:$0xff]  }
 0x249   :  { %v884_v40 = vpop.permute.xlu0 %883  ;;  %891 = vrot.lane.b32.xlu0 %v881_v37, %s2517_s16  ;;  %893 = vrot.lane.b32.xlu1 %v882_v38, %s2517_s16  ;;  %v886_v42 = vpop.permute.xlu1 %885 }
 0x24a   :  { %v887_v44 = vsel %vm878_vm5, %v884_v40, %v886_v42  ;;  %v888_v45 = vsel %vm878_vm5, %v886_v42, %v884_v40  ;;  %2222 = vmatpush3.bf16.msra.mxu0 %v2459_v26 }
 0x24b   :  { %v889_v46 = vadd.f32 %v888_v45, %v872_v30  ;;  %v890_v47 = vadd.f32 %v887_v44, %v873_v31  ;;  %v2463_v30 = vld [vmem:[%s3346_s3 + $0x108] sm:$0xff]   ;;  %2223 = vmatprep.subr.bf16.mxu0 %v2462_v29  ;;  %v2464_v31 = vld [vmem:[%s3346_s3 + $0x40] sm:$0xff]  }
 0x24c   :  { %2181 = vmatprep.subr.bf16.mxu1 %v2464_v31 }
 0x24d   :  { %900 = vrot.lane.b32.xlu0 %v889_v46, %s2517_s16  ;;  %902 = vrot.lane.b32.xlu1 %v890_v47, %s2517_s16 }
 0x24e   :  { %2224 = vmatpush3.bf16.msra.mxu0 %v2463_v30  ;;  %2182 = vmatpush3.bf16.msra.mxu1 %v2465_v32 }
 0x24f   :  { %2225 = vmatprep.subr.bf16.mxu0 %v2466_v33  ;;  %2189 = vmatprep.subr.bf16.mxu1 %v2468_v35 }
 0x252   :  { %2226 = vmatpush3.bf16.msra.mxu0 %v2467_v34 }
 0x253   :  { %2264 = vmatprep.subr.bf16.mxu0 %v2514_v51 }
 0x2bb   :  { %v892_v49 = vpop.permute.xlu0 %891  ;;  %v894_v50 = vpop.permute.xlu1 %893 }
 0x2bc   :  { %v896_v53 = vsel %vm895_vm6, %v892_v49, %v894_v50  ;;  %v897_v54 = vsel %vm895_vm6, %v894_v50, %v892_v49 }
 0x2bd   :  { %v2973_v55 = vadd.f32 %v897_v54, %v881_v37  ;;  %v2975_v56 = vadd.f32 %v896_v53, %v882_v38 }
 0x2bf   :  { %v901_v57 = vpop.permute.xlu0 %900  ;;  %908 = vrot.lane.b32.xlu0 %v2973_v55, %s2518_s17  ;;  %910 = vrot.lane.b32.xlu1 %v2975_v56, %s2518_s17  ;;  %v903_v58 = vpop.permute.xlu1 %902 }
 0x2c0   :  { %v904_v59 = vsel %vm895_vm6, %v901_v57, %v903_v58  ;;  %v905_v60 = vsel %vm895_vm6, %v903_v58, %v901_v57 }
 0x2c1   :  { %v2981_v61 = vadd.f32 %v905_v60, %v889_v46  ;;  %v2983_v62 = vadd.f32 %v904_v59, %v890_v47 }
 0x2c3   :  { %917 = vrot.lane.b32.xlu0 %v2981_v61, %s2518_s17  ;;  %919 = vrot.lane.b32.xlu1 %v2983_v62, %s2518_s17 }
 0x331   :  { %v909_v37 = vpop.permute.xlu0 %908  ;;  %v911_v38 = vpop.permute.xlu1 %910 }
 0x332   :  { %v913_v40 = vsel %vm912_vm7, %v909_v37, %v911_v38  ;;  %v914_v42 = vsel %vm912_vm7, %v911_v38, %v909_v37 }
 0x333   :  { %v915_v44 = vadd.f32 %v914_v42, %v2973_v55  ;;  %v916_v45 = vadd.f32 %v913_v40, %v2975_v56  ;;  %v2519_v55 = vmov 1966171168  }
 0x334   :  { %v939_v2 = vunpack.c.l.s4 %v2519_v55  ;;  %v2474_v55 = vld [vmem:[%s3346_s3 + $0xe0] sm:$0xff]  }
 0x335   :  { %v925_v46 = vadd.f32 %v916_v45, %v915_v44  ;;  %v918_v47 = vpop.permute.xlu0 %917  ;;  %v920_v49 = vpop.permute.xlu1 %919 }
 0x336   :  { %v921_v50 = vsel %vm912_vm7, %v918_v47, %v920_v49  ;;  %v922_v53 = vsel %vm912_vm7, %v920_v49, %v918_v47  ;;  %v940_v56 = vunpack.c.0.s8 %v939_v2  ;;  %v2475_v2 = vld [vmem:[%s3346_s3 + $0xa0] sm:$0xff]  }
 0x337   :  { %v927_v54 = vmul.f32 0.001953125, %v925_v46  ;;  %v923_v57 = vadd.f32 %v922_v53, %v2981_v61  ;;  %v924_v58 = vadd.f32 %v921_v50, %v2983_v62  ;;  %v2091_v61 = vld [vmem:[%s3345_s2 + $0x1] ss:$4 sm:$0x3]  ;;  %v2469_v53 = vld [vmem:[%s3346_s3 + $0xb8] sm:$0xff]  }
 0x338   :  { %v943_v3 = vsub.s32 %v940_v56, %v2668_v36  ;;  %v2476_v56 = vld [vmem:[%s3346_s3 + $0xd8] sm:$0xff]  }
 0x339   :  { %v926_v59 = vadd.f32 %v924_v58, %v923_v57  ;;  %v929_v22 = vmul.f32 %v927_v54, %v927_v54 }
 0x33b   :  { %v928_v60 = vmul.f32 0.001953125, %v926_v59  ;;  %v2470_v59 = vld [vmem:[%s3346_s3 + $0xf0] sm:$0xff]  }
 0x33d   :  { %v930_v63 = vsub.f32 %v928_v60, %v929_v22 }
 0x33f   :  { %v931_v0 = vmax.f32 %v930_v63, 0.0  ;;  %v2471_v63 = vld [vmem:[%s3346_s3 + $0xb0] sm:$0xff]  }
 0x341   :  { %v934_v1 = vadd.f32 1e-05, %v931_v0  ;;  %v2472_v0 = vld [vmem:[%s3346_s3 + $0xe8] sm:$0xff]  }
 0x343   :  { %2508 = vrsqrt.f32 %v934_v1  ;;  %v2473_v1 = vld [vmem:[%s3346_s3 + $0xa8] sm:$0xff]  }
 0x350   :  { %v2509_v4 = vpop.eup %2508 }
 0x351   :  { %v937_v6 = vcombine.low %v2509_v4, %v2509_v4  ;;  %v2478_v4 = vld [vmem:[%s3346_s3 + $0xd0] sm:$0xff]  }
 0x353   :  { %v944_v7 = vrot.slane %v937_v6, %v943_v3  ;;  %v2479_v6 = vld [vmem:[%s3346_s3 + $0x90] sm:$0xff]  }
 0x355   :  { %v951_v62 = vrot.slane %v944_v7, %v943_v3  ;;  %v2480_v7 = vld [vmem:[%s3346_s3 + $0xc8] sm:$0xff]  }
 0x357   :  { %v953_v8 = vmul.f32 %v2091_v61, %v951_v62  ;;  %v2481_v61 = vld [vmem:[%s3346_s3 + $0x88] sm:$0xff]   ;;  %v2482_v62 = vld [vmem:[%s3346_s3 + $0xc0] sm:$0xff]  }
 0x359   :  { %v960_v9 = vrot.slane %v953_v8, %v2925_v14  ;;  %v964_v11 = vrot.slane %v953_v8, %v2931_v16  ;;  %v2483_v8 = vld [vmem:[%s3346_s3 + $0x80] sm:$0xff]  }
 0x35b   :  { %v967_v12 = vmul.f32 %v960_v9, %v927_v54  ;;  %v968_v15 = vmul.f32 %v964_v11, %v927_v54  ;;  %v989_v13 = vmul.f32 %v964_v11, %v2937_v41  ;;  %v991_v20 = vmul.f32 %v964_v11, %v2947_v48 }
 0x35c   :  { %v988_v24 = vmul.f32 %v960_v9, %v2935_v39  ;;  %v990_v25 = vmul.f32 %v960_v9, %v2939_v43 }
 0x35d   :  { %v971_v17 = vcombine.low %v967_v12, %v968_v15 }
 0x35f   :  { %v978_v18 = vrot.slane %v971_v17, %v943_v3 }
 0x361   :  { %v985_v21 = vrot.slane %v978_v18, %v943_v3  ;;  %v2477_v3 = vld [vmem:[%s3346_s3 + $0x98] sm:$0xff]   ;;  %s2520_s3 = smov 4  }
 0x363   :  { %v987_v10 = vsub.f32 %v2092_v19, %v985_v21 }
 0x365   :  { %v1000_v23 = vrot.slane %v987_v10, %v2931_v16  ;;  %v996_v26 = vrot.slane %v987_v10, %v2925_v14  ;;  %v2093_v10 = vld [vmem:[%s3347_s4] ss:$0 sm:$0xff] }
 0x367   :  { %v1004_v27 = vadd.f32 %v1000_v23, %v989_v13  ;;  %v1006_v28 = vadd.f32 %v1000_v23, %v991_v20  ;;  %v3109_v29 = vadd.f32 %v996_v26, %v988_v24  ;;  %v1005_v30 = vadd.f32 %v996_v26, %v990_v25 }
 0x369   :  { %v1008_v31 = vrot.slane %v1004_v27, 7  ;;  %v1010_v32 = vrot.slane %v1006_v28, 7  ;;  %v1020_v33 = vrot.slane %v1004_v27, 1  ;;  %v1022_v34 = vrot.slane %v1006_v28, 1 }
 0x36a   :  { %v1007_v41 = vrot.slane %v3109_v29, 7  ;;  %v1009_v48 = vrot.slane %v1005_v30, 7  ;;  %v1019_v16 = vrot.slane %v3109_v29, 1  ;;  %v1021_v35 = vrot.slane %v1005_v30, 1 }
 0x36b   :  { %v1014_v39 = vsel %vm74_vm1, %v1010_v32, %v1008_v31  ;;  %v1026_v43 = vsel %vm87_vm3, %v1022_v34, %v1020_v33  ;;  %v1012_v42 = vsel %vm74_vm1, %v1008_v31, %v1010_v32  ;;  %v1024_v44 = vsel %vm87_vm3, %v1020_v33, %v1022_v34 }
 0x36c   :  { %v1016_v37 = vmul.f32 %v2706_v52, %v1014_v39  ;;  %v1030_v38 = vmul.f32 %v2756_v5, %v1026_v43  ;;  %v1013_v40 = vsel %vm74_vm1, %v1009_v48, %v1007_v41  ;;  %v1025_v46 = vsel %vm87_vm3, %v1021_v35, %v1019_v16 }
 0x36d   :  { %v1015_v45 = vmul.f32 %v2706_v52, %v1013_v40  ;;  %v1011_v50 = vsel %vm74_vm1, %v1007_v41, %v1009_v48  ;;  %v1029_v54 = vmul.f32 %v2756_v5, %v1025_v46  ;;  %v1023_v58 = vsel %vm87_vm3, %v1019_v16, %v1021_v35 }
 0x36e   :  { %v1032_v47 = vpack.c.bf16 %v1012_v42, %v1016_v37  ;;  %v1036_v49 = vpack.c.bf16 %v1030_v38, %v1024_v44  ;;  %v1034_v60 = vpack.c.bf16 %v1006_v28, %v1004_v27  ;;  %v1033_v9 = vpack.c.bf16 %v1005_v30, %v3109_v29 }
 0x36f   :  { %v1031_v57 = vpack.c.bf16 %v1011_v50, %v1015_v45  ;;  %v1035_v22 = vpack.c.bf16 %v1029_v54, %v1023_v58 }
 0x370   :  { %1458 = vmatprep.mubr.bf16.mxu1 %v1032_v47  ;;  %1540 = vmatprep.mubr.bf16.mxu0 %v1036_v49 }
 0x371   :  { %1459 = vmatmul.mubr.bf16.vlgmr.msra.gmra.mxu1 %v1031_v57  ;;  %1541 = vmatmul.mubr.bf16.vlgmr.msra.gmra.mxu0 %v1035_v22 }
 0x372   :  { %2190 = vmatpush3.bf16.msra.mxu1 %v2469_v53  ;;  %1499 = vmatprep.mubr.bf16.mxu1 %v1034_v60 }
 0x373   :  { %2191 = vmatprep.subr.bf16.mxu1 %v2470_v59  ;;  %2280 = vmatprep.mubr.msk.bf16.mxu0 %vm2521_vm8, %v2514_v51 }
 0x376   :  { %2192 = vmatpush3.bf16.msra.mxu1 %v2471_v63 }
 0x377   :  { %2193 = vmatprep.subr.bf16.mxu1 %v2472_v0 }
 0x37a   :  { %2194 = vmatpush3.bf16.msra.mxu1 %v2473_v1 }
 0x37b   :  { %2195 = vmatprep.subr.bf16.mxu1 %v2474_v55 }
 0x37e   :  { %2196 = vmatpush3.bf16.msra.mxu1 %v2475_v2 }
 0x37f   :  { %2197 = vmatprep.subr.bf16.mxu1 %v2476_v56 }
 0x382   :  { %2198 = vmatpush3.bf16.msra.mxu1 %v2477_v3 }
 0x383   :  { %2199 = vmatprep.subr.bf16.mxu1 %v2478_v4 }
 0x386   :  { %2200 = vmatpush3.bf16.msra.mxu1 %v2479_v6 }
 0x387   :  { %2201 = vmatprep.subr.bf16.mxu1 %v2480_v7 }
 0x38a   :  { %2202 = vmatpush3.bf16.msra.mxu1 %v2481_v61 }
 0x38b   :  { %2203 = vmatprep.subr.bf16.mxu1 %v2482_v62 }
 0x38e   :  { %2204 = vmatpush3.bf16.msra.mxu1 %v2483_v8 }
 0x391   :  { %1500 = vmatmul.mubr.bf16.vlgmr.msra.gmra.mxu1 %v1033_v9 }
 0x431   :  { %v2183_v11 = vpop.f32.mrf.mxu1  ;;  %v2227_v15 = vpop.f32.mrf.mxu0 }
 0x433   :  { %v2184_v12 = vpop.f32.mrf.mxu1  ;;  %v2228_v18 = vpop.f32.mrf.mxu0 }
 0x434   :  { %v2185_v21 = vadd.f32 %v2184_v12, %v2183_v11  ;;  %v2229_v28 = vadd.f32 %v2228_v18, %v2227_v15  ;;  %v2484_v11 = vld [vmem:[%s3348_s5 + $0x78] sm:$0xff]   ;;  %v2488_v18 = vld [vmem:[%s3348_s5 + $0x30] sm:$0xff]  }
 0x435   :  { %v2186_v17 = vpop.f32.mrf.mxu1  ;;  %v2230_v20 = vpop.f32.mrf.mxu0  ;;  %v2485_v12 = vld [vmem:[%s3348_s5 + $0x38] sm:$0xff]   ;;  %2233 = vmatprep.subr.bf16.mxu1 %v2484_v11 }
 0x436   :  { %v1461_v24 = vadd.f32 %v2185_v21, %v2093_v10  ;;  %v2486_v15 = vld [vmem:[%s3348_s5 + $0xb8] sm:$0xff]   ;;  %2234 = vmatpush3.bf16.msra.mxu1 %v2485_v12  ;;  %v2490_v21 = vld [vmem:[%s3348_s5 + $0x68] sm:$0xff]  }
 0x437   :  { %v2187_v19 = vpop.f32.mrf.mxu1  ;;  %v2231_v30 = vpop.f32.mrf.mxu0  ;;  %2265 = vmatpush3.bf16.msra.mxu0 %v2486_v15 }
 0x438   :  { %v2188_v25 = vadd.f32 %v2187_v19, %v2186_v17  ;;  %v2232_v41 = vadd.f32 %v2231_v30, %v2230_v20  ;;  %v2487_v17 = vld [vmem:[%s3348_s5 + $0x70] sm:$0xff]   ;;  %2266 = vmatprep.subr.bf16.mxu0 %v2514_v51  ;;  %v2493_v20 = vld [vmem:[%s3348_s5 + $0x60] sm:$0xff]  }
 0x439   :  { %2235 = vmatprep.subr.bf16.mxu1 %v2487_v17  ;;  %v2489_v19 = vld [vmem:[%s3348_s5 + $0xb0] sm:$0xff]  }
 0x43a   :  { %v1464_v32 = vadd.f32 %v2188_v25, %v2093_v10  ;;  %2236 = vmatpush3.bf16.msra.mxu1 %v2488_v18  ;;  %v2491_v10 = vld [vmem:[%s3348_s5 + $0x28] sm:$0xff]   ;;  %v2496_v25 = vld [vmem:[%s3348_s5 + $0x58] sm:$0xff]   ;;  %v2501_v30 = vld [vmem:[%s3348_s5 + $0x90] sm:$0xff]  }
 0x43b   :  { %2267 = vmatpush3.bf16.msra.mxu0 %v2489_v19  ;;  %2237 = vmatprep.subr.bf16.mxu1 %v2490_v21 }
 0x43c   :  { %2268 = vmatprep.subr.bf16.mxu0 %v2514_v51 }
 0x43e   :  { %2238 = vmatpush3.bf16.msra.mxu1 %v2491_v10 }
 0x43f   :  { %2239 = vmatprep.subr.bf16.mxu1 %v2493_v20 }
 0x451   :  { %v2205_v13 = vpop.f32.mrf.mxu1 }
 0x453   :  { %v2206_v23 = vpop.f32.mrf.mxu1 }
 0x454   :  { %v2207_v26 = vadd.f32 %v2206_v23, %v2205_v13  ;;  %v2492_v13 = vld [vmem:[%s3348_s5 + $0xa8] sm:$0xff]   ;;  %v2494_v23 = vld [vmem:[%s3348_s5 + $0x20] sm:$0xff]  }
 0x455   :  { %v2208_v27 = vpop.f32.mrf.mxu1  ;;  %2269 = vmatpush3.bf16.msra.mxu0 %v2492_v13  ;;  %2240 = vmatpush3.bf16.msra.mxu1 %v2494_v23 }
 0x456   :  { %v1502_v29 = vadd.f32 %v2207_v26, %v1461_v24  ;;  %v2495_v24 = vld [vmem:[%s3348_s5 + $0xa0] sm:$0xff]   ;;  %2270 = vmatprep.subr.bf16.mxu0 %v2514_v51  ;;  %v2497_v26 = vld [vmem:[%s3348_s5 + $0x18] sm:$0xff]   ;;  %2241 = vmatprep.subr.bf16.mxu1 %v2496_v25 }
 0x457   :  { %v2209_v31 = vpop.f32.mrf.mxu1 }
 0x458   :  { %v1543_v33 = vadd.f32 %v2229_v28, %v1502_v29  ;;  %v2210_v34 = vadd.f32 %v2209_v31, %v2208_v27  ;;  %v2498_v27 = vld [vmem:[%s3348_s5 + $0x98] sm:$0xff]   ;;  %v2499_v28 = vld [vmem:[%s3348_s5 + $0x50] sm:$0xff]   ;;  %v2502_v31 = vld [vmem:[%s3348_s5 + $0x48] sm:$0xff]  }
 0x459   :  { %2271 = vmatpush3.bf16.msra.mxu0 %v2495_v24  ;;  %v2500_v29 = vld [vmem:[%s3348_s5 + $0x10] sm:$0xff]   ;;  %2242 = vmatpush3.bf16.msra.mxu1 %v2497_v26 }
 0x45a   :  { %v1505_v48 = vadd.f32 %v2210_v34, %v1464_v32  ;;  %v3182_v16 = vmax.f32 %v1543_v33, 0.0  ;;  %2272 = vmatprep.subr.bf16.mxu0 %v2514_v51  ;;  %2243 = vmatprep.subr.bf16.mxu1 %v2499_v28  ;;  %v2503_v32 = vld [vmem:[%s3348_s5 + $0x8] sm:$0xff]   ;;  %v2505_v34 = vld [vmem:[%s3348_s5 + $0x40] sm:$0xff]  }
 0x45b   :  { %v2504_v33 = vld [vmem:[%s3348_s5 + $0x88] sm:$0xff]  }
 0x45c   :  { %v1546_v35 = vadd.f32 %v2232_v41, %v1505_v48  ;;  %v1558_v43 = vmul.f32 %v3182_v16, %v3182_v16  ;;  %v2506_v41 = vld [vmem:[%s3348_s5] sm:$0xff]  }
 0x45d   :  { %2273 = vmatpush3.bf16.msra.mxu0 %v2498_v27  ;;  %2244 = vmatpush3.bf16.msra.mxu1 %v2500_v29  ;;  %v2507_v48 = vld [vmem:[%s3348_s5 + $0x80] sm:$0xff]  }
 0x45e   :  { %v3184_v39 = vmax.f32 %v1546_v35, 0.0  ;;  %2274 = vmatprep.subr.bf16.mxu0 %v2514_v51  ;;  %2245 = vmatprep.subr.bf16.mxu1 %v2502_v31 }
 0x460   :  { %v1551_v37 = vadd.f32 %v3184_v39, %v3182_v16  ;;  %v1559_v38 = vmul.f32 %v3184_v39, %v3184_v39 }
 0x461   :  { %2275 = vmatpush3.bf16.msra.mxu0 %v2501_v30  ;;  %2246 = vmatpush3.bf16.msra.mxu1 %v2503_v32 }
 0x462   :  { %v1552_v40 = vrot.slane %v1551_v37, 4  ;;  %v1560_v42 = vadd.f32 %v1559_v38, %v1558_v43  ;;  %2276 = vmatprep.subr.bf16.mxu0 %v2514_v51  ;;  %2247 = vmatprep.subr.bf16.mxu1 %v2505_v34 }
 0x464   :  { %v1553_v44 = vadd.f32 %v1552_v40, %v1551_v37  ;;  %v1561_v45 = vrot.slane %v1560_v42, 4 }
 0x465   :  { %2277 = vmatpush3.bf16.msra.mxu0 %v2504_v33  ;;  %2248 = vmatpush3.bf16.msra.mxu1 %v2506_v41 }
 0x466   :  { %v1554_v46 = vrot.slane %v1553_v44, 2  ;;  %v1562_v47 = vadd.f32 %v1561_v45, %v1560_v42  ;;  %2278 = vmatprep.subr.bf16.mxu0 %v2514_v51 }
 0x468   :  { %v1555_v49 = vadd.f32 %v1554_v46, %v1553_v44  ;;  %v1563_v50 = vrot.slane %v1562_v47, 2 }
 0x469   :  { %2279 = vmatpush3.bf16.msra.mxu0 %v2507_v48 }
 0x46a   :  { %v1556_v53 = vrot.slane %v1555_v49, 1  ;;  %v1564_v54 = vadd.f32 %v1563_v50, %v1562_v47 }
 0x46c   :  { %v1557_v57 = vadd.f32 %v1556_v53, %v1555_v49  ;;  %v1565_v58 = vrot.slane %v1564_v54, 1  ;;  %v1602_v49 = vld [vmem:[%s3347_s4 + $0x1] sm:$0x1]  ;;  %v1606_v53 = vld [vmem:[%s3347_s4 + $0x2] sm:$0x1] }
 0x46e   :  { %1567 = vrot.lane.b32.xlu0 %v1557_v57, %s2520_s3  ;;  %v1566_v59 = vadd.f32 %v1565_v58, %v1564_v54 }
 0x470   :  { %1570 = vrot.lane.b32.xlu1 %v1566_v59, %s2520_s3 }
 0x4e0   :  { %v1568_v22 = vpop.permute.xlu0 %1567 }
 0x4e1   :  { %v1569_v60 = vadd.f32 %v1568_v22, %v1557_v57 }
 0x4e2   :  { %v1571_v63 = vpop.permute.xlu1 %1570 }
 0x4e3   :  { %v1572_v0 = vadd.f32 %v1571_v63, %v1566_v59  ;;  %1573 = vrot.lane.b32.xlu0 %v1569_v60, %s2515_s1 }
 0x4e5   :  { %1576 = vrot.lane.b32.xlu1 %v1572_v0, %s2515_s1 }
 0x555   :  { %v1574_v1 = vpop.permute.xlu0 %1573 }
 0x556   :  { %v1575_v55 = vadd.f32 %v1574_v1, %v1569_v60 }
 0x557   :  { %v1577_v2 = vpop.permute.xlu1 %1576 }
 0x558   :  { %v1578_v56 = vadd.f32 %v1577_v2, %v1572_v0  ;;  %1579 = vrot.lane.b32.xlu0 %v1575_v55, %s2516_s15 }
 0x55a   :  { %1582 = vrot.lane.b32.xlu1 %v1578_v56, %s2516_s15 }
 0x5ca   :  { %v1580_v3 = vpop.permute.xlu0 %1579 }
 0x5cb   :  { %v1581_v4 = vadd.f32 %v1580_v3, %v1575_v55 }
 0x5cc   :  { %v1583_v6 = vpop.permute.xlu1 %1582 }
 0x5cd   :  { %v1584_v7 = vadd.f32 %v1583_v6, %v1578_v56  ;;  %1585 = vrot.lane.b32.xlu0 %v1581_v4, %s2517_s16 }
 0x5cf   :  { %1588 = vrot.lane.b32.xlu1 %v1584_v7, %s2517_s16 }
 0x63f   :  { %v1586_v61 = vpop.permute.xlu0 %1585 }
 0x640   :  { %v3200_v62 = vadd.f32 %v1586_v61, %v1581_v4 }
 0x641   :  { %v1589_v8 = vpop.permute.xlu1 %1588 }
 0x642   :  { %v3202_v9 = vadd.f32 %v1589_v8, %v1584_v7  ;;  %1591 = vrot.lane.b32.xlu0 %v3200_v62, %s2518_s17 }
 0x644   :  { %1594 = vrot.lane.b32.xlu1 %v3202_v9, %s2518_s17 }
 0x6b4   :  { %v1592_v35 = vpop.permute.xlu0 %1591 }
 0x6b5   :  { %v1593_v43 = vadd.f32 %v1592_v35, %v3200_v62 }
 0x6b6   :  { %v1595_v37 = vpop.permute.xlu1 %1594 }
 0x6b7   :  { %v1597_v38 = vmul.f32 0.001953125, %v1593_v43  ;;  %v1596_v40 = vadd.f32 %v1595_v37, %v3202_v9 }
 0x6b9   :  { %v1599_v42 = vmul.f32 %v1597_v38, %v1597_v38  ;;  %v1598_v44 = vmul.f32 0.001953125, %v1596_v40 }
 0x6bb   :  { %v1600_v45 = vsub.f32 %v1598_v44, %v1599_v42 }
 0x6bd   :  { %v1601_v46 = vmax.f32 %v1600_v45, 0.0 }
 0x6bf   :  { %v1603_v47 = vadd.f32 1e-05, %v1601_v46 }
 0x6c1   :  { %2510 = vrsqrt.f32 %v1603_v47 }
 0x6ce   :  { %v2511_v51 = vpop.eup %2510 }
 0x6cf   :  { %v1605_v50 = vmul.f32 %v2511_v51, %v1602_v49 }
 0x6d1   :  { %v1607_v54 = vmul.f32 %v1605_v50, %v1597_v38  ;;  %v1612_v57 = vrot.slane %v1605_v50, %v2925_v14 }
 0x6d3   :  { %v1608_v58 = vsub.f32 %v1606_v53, %v1607_v54  ;;  %v1613_v59 = vmul.f32 %v1612_v57, %v3182_v16  ;;  %v1614_v22 = vmul.f32 %v1612_v57, %v3184_v39 }
 0x6d5   :  { %v1618_v60 = vrot.slane %v1608_v58, %v2925_v14 }
 0x6d7   :  { %v1619_v63 = vadd.f32 %v1618_v60, %v1613_v59  ;;  %v1620_v0 = vadd.f32 %v1618_v60, %v1614_v22 }
 0x6d9   :  { %v1634_v1 = vpack.c.bf16 %v1620_v0, %v1619_v63  ;;  %v1621_v55 = vrot.slane %v1619_v63, 7  ;;  %v1622_v2 = vrot.slane %v1620_v0, 7  ;;  %v1627_v56 = vrot.slane %v1619_v63, 1 }
 0x6da   :  { %v1628_v3 = vrot.slane %v1620_v0, 1 }
 0x6db   :  { %1865 = vmatprep.mubr.bf16.mxu1 %v1634_v1  ;;  %v1624_v4 = vsel %vm74_vm1, %v1622_v2, %v1621_v55  ;;  %v1623_v39 = vsel %vm74_vm1, %v1621_v55, %v1622_v2 }
 0x6dc   :  { %v1625_v6 = vmul.f32 %v2706_v52, %v1624_v4  ;;  %v1630_v16 = vsel %vm87_vm3, %v1628_v3, %v1627_v56  ;;  %v1629_v62 = vsel %vm87_vm3, %v1627_v56, %v1628_v3  ;;  %v2142_v52 = vld [vmem:[%s3349_s6] ss:$0 sm:$0xff] }
 0x6dd   :  { %v1632_v7 = vmul.f32 %v2756_v5, %v1630_v16 }
 0x6de   :  { %v1633_v61 = vpack.c.bf16 %v1623_v39, %v1625_v6 }
 0x6df   :  { %v1635_v8 = vpack.c.bf16 %v1632_v7, %v1629_v62  ;;  %v1968_v7 = vld [vmem:[%s3349_s6 + $0x1] sm:$0x1] }
 0x6e0   :  { %1866 = vmatmul.mubr.bf16.vlgmr.msra.gmra.mxu1 %v1633_v61 }
 0x6e1   :  { %2281 = vmatmul.mubr.bf16.vlgmr.msra.gmra.mxu0 %v1635_v8  ;;  %v1972_v8 = vld [vmem:[%s3349_s6 + $0x2] sm:$0x1] }
 0x7a0   :  { %v2249_v9 = vpop.f32.mrf.mxu1 }
 0x7a1   :  { %v1908_v11 = vpop.f32.mrf.mxu0 }
 0x7a2   :  { %v2250_v12 = vpop.f32.mrf.mxu1 }
 0x7a3   :  { %v2251_v15 = vadd.f32 %v2250_v12, %v2249_v9  ;;  %v2282_v17 = vpop.f32.mrf.mxu0 }
 0x7a4   :  { %v2252_v18 = vpop.f32.mrf.mxu1 }
 0x7a5   :  { %v1868_v19 = vadd.f32 %v2251_v15, %v2142_v52  ;;  %v1911_v21 = vpop.f32.mrf.mxu0 }
 0x7a6   :  { %v2253_v5 = vpop.f32.mrf.mxu1 }
 0x7a7   :  { %v1909_v10 = vadd.f32 %v1908_v11, %v1868_v19  ;;  %v2254_v13 = vadd.f32 %v2253_v5, %v2252_v18  ;;  %v2283_v36 = vpop.f32.mrf.mxu0 }
 0x7a9   :  { %v1871_v20 = vadd.f32 %v2254_v13, %v2142_v52  ;;  %v3313_v23 = vmax.f32 %v1909_v10, 0.0 }
 0x7ab   :  { %v1912_v24 = vadd.f32 %v1911_v21, %v1871_v20  ;;  %v1924_v26 = vmul.f32 %v3313_v23, %v3313_v23 }
 0x7ad   :  { %v1916_v25 = vmax.f32 %v1912_v24, 0.0 }
 0x7af   :  { %v1917_v27 = vadd.f32 %v1916_v25, %v3313_v23  ;;  %v1925_v28 = vmul.f32 %v1916_v25, %v1916_v25 }
 0x7b1   :  { %v1918_v29 = vrot.slane %v1917_v27, 4  ;;  %v1926_v30 = vadd.f32 %v1925_v28, %v1924_v26 }
 0x7b3   :  { %v1919_v31 = vadd.f32 %v1918_v29, %v1917_v27  ;;  %v1927_v32 = vrot.slane %v1926_v30, 4 }
 0x7b5   :  { %v1920_v33 = vrot.slane %v1919_v31, 2  ;;  %v1928_v34 = vadd.f32 %v1927_v32, %v1926_v30 }
 0x7b7   :  { %v1921_v41 = vadd.f32 %v1920_v33, %v1919_v31  ;;  %v1929_v48 = vrot.slane %v1928_v34, 2 }
 0x7b9   :  { %v1922_v35 = vrot.slane %v1921_v41, 1  ;;  %v1930_v43 = vadd.f32 %v1929_v48, %v1928_v34 }
 0x7bb   :  { %v1923_v37 = vadd.f32 %v1922_v35, %v1921_v41  ;;  %v1931_v38 = vrot.slane %v1930_v43, 1 }
 0x7bd   :  { %1933 = vrot.lane.b32.xlu0 %v1923_v37, %s2520_s3  ;;  %v1932_v40 = vadd.f32 %v1931_v38, %v1930_v43 }
 0x7bf   :  { %1936 = vrot.lane.b32.xlu1 %v1932_v40, %s2520_s3 }
 0x82f   :  { %v1934_v42 = vpop.permute.xlu0 %1933 }
 0x830   :  { %v1935_v44 = vadd.f32 %v1934_v42, %v1923_v37 }
 0x831   :  { %v1937_v45 = vpop.permute.xlu1 %1936 }
 0x832   :  { %v1938_v46 = vadd.f32 %v1937_v45, %v1932_v40  ;;  %1939 = vrot.lane.b32.xlu0 %v1935_v44, %s2515_s1 }
 0x834   :  { %1942 = vrot.lane.b32.xlu1 %v1938_v46, %s2515_s1 }
 0x8a4   :  { %v1940_v47 = vpop.permute.xlu0 %1939 }
 0x8a5   :  { %v1941_v49 = vadd.f32 %v1940_v47, %v1935_v44 }
 0x8a6   :  { %v1943_v51 = vpop.permute.xlu1 %1942 }
 0x8a7   :  { %v1944_v50 = vadd.f32 %v1943_v51, %v1938_v46  ;;  %1945 = vrot.lane.b32.xlu0 %v1941_v49, %s2516_s15 }
 0x8a9   :  { %1948 = vrot.lane.b32.xlu1 %v1944_v50, %s2516_s15 }
 0x919   :  { %v1946_v53 = vpop.permute.xlu0 %1945 }
 0x91a   :  { %v1947_v54 = vadd.f32 %v1946_v53, %v1941_v49 }
 0x91b   :  { %v1949_v57 = vpop.permute.xlu1 %1948 }
 0x91c   :  { %v1950_v58 = vadd.f32 %v1949_v57, %v1944_v50  ;;  %1951 = vrot.lane.b32.xlu0 %v1947_v54, %s2517_s16 }
 0x91e   :  { %1954 = vrot.lane.b32.xlu1 %v1950_v58, %s2517_s16 }
 0x98e   :  { %v1952_v59 = vpop.permute.xlu0 %1951 }
 0x98f   :  { %v1953_v22 = vadd.f32 %v1952_v59, %v1947_v54 }
 0x990   :  { %v1955_v60 = vpop.permute.xlu1 %1954 }
 0x991   :  { %v1956_v63 = vadd.f32 %v1955_v60, %v1950_v58  ;;  %1957 = vrot.lane.b32.xlu0 %v1953_v22, %s2518_s17 }
 0x993   :  { %1960 = vrot.lane.b32.xlu1 %v1956_v63, %s2518_s17 }
 0xa03   :  { %v1958_v0 = vpop.permute.xlu0 %1957 }
 0xa04   :  { %v1959_v1 = vadd.f32 %v1958_v0, %v1953_v22 }
 0xa05   :  { %v1961_v55 = vpop.permute.xlu1 %1960 }
 0xa06   :  { %v1963_v2 = vmul.f32 0.001953125, %v1959_v1  ;;  %v1962_v56 = vadd.f32 %v1961_v55, %v1956_v63 }
 0xa08   :  { %v1965_v3 = vmul.f32 %v1963_v2, %v1963_v2  ;;  %v1964_v4 = vmul.f32 0.001953125, %v1962_v56 }
 0xa0a   :  { %v1966_v6 = vsub.f32 %v1964_v4, %v1965_v3 }
 0xa0c   :  { %v1967_v16 = vmax.f32 %v1966_v6, 0.0 }
 0xa0e   :  { %v1969_v39 = vadd.f32 1e-05, %v1967_v16 }
 0xa10   :  { %2512 = vrsqrt.f32 %v1969_v39 }
 0xa1d   :  { %v2513_v61 = vpop.eup %2512 }
 0xa1e   :  { %v1971_v62 = vmul.f32 %v2513_v61, %v1968_v7 }
 0xa20   :  { %v1973_v9 = vmul.f32 %v1971_v62, %v1963_v2  ;;  %v1978_v11 = vrot.slane %v1971_v62, %v2925_v14 }
 0xa22   :  { %v1974_v52 = vsub.f32 %v1972_v8, %v1973_v9  ;;  %v1979_v12 = vmul.f32 %v1978_v11, %v3313_v23  ;;  %v1980_v15 = vmul.f32 %v1978_v11, %v1916_v25 }
 0xa24   :  { %v1984_v17 = vrot.slane %v1974_v52, %v2925_v14 }
 0xa26   :  { %v1985_v18 = vadd.f32 %v1984_v17, %v1979_v12  ;;  %v1986_v19 = vadd.f32 %v1984_v17, %v1980_v15 }
 0xa28   :  { %1987 = vst [vmem:[%s3350_s7] sm:$0xff] %v1985_v18  ;;  %1988 = vst [vmem:[%s3350_s7 + $0x8] sm:$0xff] %v1986_v19 }

</bundles_post_ra>
